<compile_context>
chip_gen: v6e
topology: v6e:2x2x1
jax: 0.10.0
libtpu: 0.0.40
codegen_flags: <defaults>
</compile_context>

<pallas_src>
import functools

import jax
import jax.numpy as jnp
from jax.experimental import pallas as pl
from jax.experimental.pallas import tpu as pltpu

LANE = 128
TIME_CHUNK = 8  # time steps folded into one grid step (sublane-dense output)


def _round_up(n, m):
    return ((n + m - 1) // m) * m


def lstm_chunk_kernel(x_ref, h0_ref, c0_ref, wih_ref, whh_ref, b_ref,
                      who_ref, bho_ref, out_ref, hn_ref, cn_ref,
                      h_s, c_s, hbuf, *, seq_len, chunk_steps):
    """One grid step == `chunk_steps` LSTM time steps (weights VMEM-resident)."""
    HP = h_s.shape[-1]
    chunk = pl.program_id(0)

    @pl.when(chunk == 0)
    def _init():
        # h0/c0 are read only here, before any h_n/c_n write-back (keeps the
        # input_output_aliases invariant).
        h_s[...] = h0_ref[...]
        c_s[...] = c0_ref[...]

    # Hoisted input projection for the whole chunk: M = chunk_steps MXU rows.
    xg = (jnp.dot(x_ref[...], wih_ref[...], preferred_element_type=jnp.float32)
          + b_ref[...])

    # Serial recurrence: only the (1,HP)@(HP,4HP) dot + gate math per step.
    whh = whh_ref[...]
    h = h_s[...]
    c = c_s[...]
    for t in range(chunk_steps):
        valid = (chunk * chunk_steps + t) < seq_len
        gates = xg[t:t + 1, :] + jnp.dot(h, whh,
                                         preferred_element_type=jnp.float32)
        # Gate order [i, f, o | g]: one contiguous sigmoid, one tanh.
        sig = jax.nn.sigmoid(gates[:, :3 * HP])
        i_g = sig[:, 0 * HP:1 * HP]
        f_g = sig[:, 1 * HP:2 * HP]
        o_g = sig[:, 2 * HP:3 * HP]
        g_g = jnp.tanh(gates[:, 3 * HP:4 * HP])
        c_new = f_g * c + i_g * g_g
        h_new = o_g * jnp.tanh(c_new)
        # Mask padded steps so the zero-padded tail never changes h/c.
        h = jnp.where(valid, h_new, h)
        c = jnp.where(valid, c_new, c)
        hbuf[pl.ds(t, 1), :] = h
    h_s[...] = h
    c_s[...] = c

    # Batched h2o Linear + softmax over the chunk's h rows (off the serial
    # tail).  Padded logits lanes carry a -1e30 bias -> exp == 0.
    logits = (jnp.dot(hbuf[...], who_ref[...],
                      preferred_element_type=jnp.float32) + bho_ref[...])
    m = jnp.max(logits, axis=-1, keepdims=True)
    e = jnp.exp(logits - m)
    out_ref[...] = e * pl.reciprocal(jnp.sum(e, axis=-1, keepdims=True),
                                     approx=True)

    hn_ref[...] = h
    cn_ref[...] = c


def prepare_kernel_params(params):
    """One-time weight layout prep: transpose + gate-reorder + lane padding."""
    w_ih, w_hh = params["w_ih"], params["w_hh"]
    b_ih, b_hh = params["b_ih"], params["b_hh"]
    w_ho, b_ho = params["w_ho"], params["b_ho"]

    H = w_hh.shape[1]
    I = w_ih.shape[1]
    O = w_ho.shape[0]
    IP, HP, OP = _round_up(I, LANE), _round_up(H, LANE), _round_up(O, LANE)

    wih_t = jnp.transpose(w_ih).astype(jnp.float32)   # (I, 4H)
    whh_t = jnp.transpose(w_hh).astype(jnp.float32)   # (H, 4H)
    b_sum = (b_ih + b_hh).astype(jnp.float32)         # (4H,)

    # Destination gate order [i, f, o, g]; PyTorch source order is [i, f, g, o].
    src_order = (0, 1, 3, 2)
    wih_cat = jnp.zeros((IP, 4 * HP), jnp.float32)
    whh_cat = jnp.zeros((HP, 4 * HP), jnp.float32)
    b_cat = jnp.zeros((1, 4 * HP), jnp.float32)
    for dst, src in enumerate(src_order):
        wih_cat = wih_cat.at[:I, dst * HP:dst * HP + H].set(
            wih_t[:, src * H:(src + 1) * H])
        whh_cat = whh_cat.at[:H, dst * HP:dst * HP + H].set(
            whh_t[:, src * H:(src + 1) * H])
        b_cat = b_cat.at[:, dst * HP:dst * HP + H].set(
            b_sum[src * H:(src + 1) * H])

    who_t = jnp.zeros((HP, OP), jnp.float32).at[:H, :O].set(
        jnp.transpose(w_ho).astype(jnp.float32))
    # -1e30 bias on padded output lanes -> they vanish under softmax.
    bho_p = jnp.full((1, OP), -1e30, jnp.float32).at[:, :O].set(
        b_ho.astype(jnp.float32))

    return {"wih_cat": wih_cat, "whh_cat": whh_cat, "b_cat": b_cat,
            "who_t": who_t, "bho_p": bho_p, "dims": (I, H, O, IP, HP, OP)}


def lstm_net_forward_seq(x_seq, hidden, kparams, chunk_steps=TIME_CHUNK):
    """Runs T LSTM_net.forward steps in ONE pallas_call.

    x_seq: (T, I); hidden: (h0, c0) each (1, 1, H).
    Returns (outputs (T, O), (h_n, c_n) each (1, 1, H)).
    """
    I, H, O, IP, HP, OP = kparams["dims"]
    T = x_seq.shape[0]
    h0, c0 = hidden

    T_pad = _round_up(max(T, 1), chunk_steps)
    num_chunks = T_pad // chunk_steps

    x_pad = jnp.zeros((T_pad, IP), jnp.float32).at[:T, :I].set(
        x_seq.astype(jnp.float32))
    h_pad = jnp.zeros((1, HP), jnp.float32).at[:, :H].set(
        h0.reshape(1, H).astype(jnp.float32))
    c_pad = jnp.zeros((1, HP), jnp.float32).at[:, :H].set(
        c0.reshape(1, H).astype(jnp.float32))

    kernel = functools.partial(lstm_chunk_kernel, seq_len=T,
                               chunk_steps=chunk_steps)

    out_pad, hn_pad, cn_pad = pl.pallas_call(
        kernel,
        out_shape=(
            jax.ShapeDtypeStruct((T_pad, OP), jnp.float32),
            jax.ShapeDtypeStruct((1, HP), jnp.float32),
            jax.ShapeDtypeStruct((1, HP), jnp.float32),
        ),
        grid_spec=pltpu.PrefetchScalarGridSpec(
            num_scalar_prefetch=0,
            grid=(num_chunks,),
            in_specs=[
                pl.BlockSpec((chunk_steps, IP), lambda i: (i, 0)),   # x chunk
                pl.BlockSpec((1, HP), lambda i: (0, 0)),             # h0
                pl.BlockSpec((1, HP), lambda i: (0, 0)),             # c0
                pl.BlockSpec((IP, 4 * HP), lambda i: (0, 0)),        # W_ih^T
                pl.BlockSpec((HP, 4 * HP), lambda i: (0, 0)),        # W_hh^T
                pl.BlockSpec((1, 4 * HP), lambda i: (0, 0)),         # fused b
                pl.BlockSpec((HP, OP), lambda i: (0, 0)),            # W_ho^T
                pl.BlockSpec((1, OP), lambda i: (0, 0)),             # b_ho
            ],
            out_specs=(
                pl.BlockSpec((chunk_steps, OP), lambda i: (i, 0)),   # softmax
                pl.BlockSpec((1, HP), lambda i: (0, 0)),             # h_n
                pl.BlockSpec((1, HP), lambda i: (0, 0)),             # c_n
            ),
            scratch_shapes=[
                pltpu.VMEM((1, HP), jnp.float32),            # recurrent h
                pltpu.VMEM((1, HP), jnp.float32),            # cell state c
                pltpu.VMEM((chunk_steps, HP), jnp.float32),  # chunk h rows
            ],
        ),
        input_output_aliases={1: 1, 2: 2},   # h0 -> h_n, c0 -> c_n
        compiler_params=pltpu.CompilerParams(
            dimension_semantics=("arbitrary",)),
    )(x_pad, h_pad, c_pad, kparams["wih_cat"], kparams["whh_cat"],
      kparams["b_cat"], kparams["who_t"], kparams["bho_p"])

    outs = out_pad[:T, :O]                         # (T, O)
    h_n = hn_pad[:, :H].reshape(1, 1, H)
    c_n = cn_pad[:, :H].reshape(1, 1, H)
    return outs, (h_n, c_n)


def lstm_net_forward(x, hidden, kparams):
    """Single-step forward, matching LSTM_net.forward (input.view(1, 1, -1))."""
    outs, hidden_n = lstm_net_forward_seq(x.reshape(1, -1), hidden, kparams)
    return outs.reshape(1, -1), hidden_n


def init_params(key, inputsize, hiddensize, outputsize):
    """Deterministic parameter init (uniform ±1/sqrt(fan), like PyTorch)."""
    ks = jax.random.split(key, 6)
    klstm = 1.0 / jnp.sqrt(hiddensize)
    klin = 1.0 / jnp.sqrt(hiddensize)
    u = lambda k, shape, scale: jax.random.uniform(
        k, shape, minval=-scale, maxval=scale, dtype=jnp.float32)
    return {
        "w_ih": u(ks[0], (4 * hiddensize, inputsize), klstm),
        "w_hh": u(ks[1], (4 * hiddensize, hiddensize), klstm),
        "b_ih": u(ks[2], (4 * hiddensize,), klstm),
        "b_hh": u(ks[3], (4 * hiddensize,), klstm),
        "w_ho": u(ks[4], (outputsize, hiddensize), klin),
        "b_ho": u(ks[5], (outputsize,), klin),
    }


def reference_forward(x, hidden, params):
    """Pure-JAX reference of LSTM_net.forward (single step)."""
    H = params["w_hh"].shape[1]
    h0, c0 = hidden
    x = x.reshape(1, -1)
    h = h0.reshape(1, H)
    c = c0.reshape(1, H)
    gates = (x @ params["w_ih"].T + params["b_ih"]
             + h @ params["w_hh"].T + params["b_hh"])
    i = jax.nn.sigmoid(gates[:, 0 * H:1 * H])
    f = jax.nn.sigmoid(gates[:, 1 * H:2 * H])
    g = jnp.tanh(gates[:, 2 * H:3 * H])
    o = jax.nn.sigmoid(gates[:, 3 * H:4 * H])
    c_new = f * c + i * g
    h_new = o * jnp.tanh(c_new)
    logits = h_new @ params["w_ho"].T + params["b_ho"]
    out = jax.nn.softmax(logits, axis=-1)
    return out, (h_new.reshape(1, 1, H), c_new.reshape(1, 1, H))


def _reference_seq(x_seq, hidden, params):
    outs = []
    hid = hidden
    for t in range(x_seq.shape[0]):
        o_t, hid = reference_forward(x_seq[t], hid, params)
        outs.append(o_t)
    return jnp.concatenate(outs, axis=0), hid


if __name__ == "__main__":
    inputsize, hiddensize, outputsize = 16, 32, 16

    key = jax.random.PRNGKey(0)
    kp, kx, ks1, ks2 = jax.random.split(key, 4)
    params = init_params(kp, inputsize, hiddensize, outputsize)
    kparams = prepare_kernel_params(params)   # one-time layout prep

    hidden0 = (jnp.zeros((1, 1, hiddensize), jnp.float32),
               jnp.zeros((1, 1, hiddensize), jnp.float32))

    # --- single step: exact LSTM_net.forward semantics ---
    x = jax.random.normal(kx, (inputsize,), dtype=jnp.float32)
    out, (h_n, c_n) = lstm_net_forward(x, hidden0, kparams)
    jax.block_until_ready((out, h_n, c_n))

    out_ref, (h_ref, c_ref) = reference_forward(x, hidden0, params)
    assert out.shape == (1, outputsize)
    assert h_n.shape == (1, 1, hiddensize) and c_n.shape == (1, 1, hiddensize)
    assert jnp.allclose(out, out_ref, atol=1e-3), "output mismatch vs reference"
    assert jnp.allclose(h_n, h_ref, atol=1e-4), "h_n mismatch vs reference"
    assert jnp.allclose(c_n, c_ref, atol=1e-4), "c_n mismatch vs reference"

    # --- fused sequence, T a multiple of the chunk size ---
    seqlen = 8
    x_seq = jax.random.normal(ks1, (seqlen, inputsize), dtype=jnp.float32)
    outs, (h_T, c_T) = lstm_net_forward_seq(x_seq, hidden0, kparams)
    jax.block_until_ready((outs, h_T, c_T))

    ref_outs, ref_hid = _reference_seq(x_seq, hidden0, params)
    assert outs.shape == (seqlen, outputsize)
    assert jnp.allclose(outs, ref_outs, atol=1e-3), "seq output mismatch"
    assert jnp.allclose(h_T, ref_hid[0], atol=1e-4), "seq h_n mismatch"
    assert jnp.allclose(c_T, ref_hid[1], atol=1e-4), "seq c_n mismatch"

    # --- fused sequence, T NOT a multiple of the chunk size (mask path) ---
    seqlen2 = 13
    x_seq2 = jax.random.normal(ks2, (seqlen2, inputsize), dtype=jnp.float32)
    outs2, (h_T2, c_T2) = lstm_net_forward_seq(x_seq2, hidden0, kparams)
    jax.block_until_ready((outs2, h_T2, c_T2))

    ref_outs2, ref_hid2 = _reference_seq(x_seq2, hidden0, params)
    assert outs2.shape == (seqlen2, outputsize)
    assert jnp.allclose(outs2, ref_outs2, atol=1e-3), "ragged seq output mismatch"
    assert jnp.allclose(h_T2, ref_hid2[0], atol=1e-4), "ragged seq h_n mismatch"
    assert jnp.allclose(c_T2, ref_hid2[1], atol=1e-4), "ragged seq c_n mismatch"

    print("KERNEL_OK")
</pallas_src>

<mosaic_0001>
module attributes {stable_mosaic.version = 11 : i64} {
  func.func @lstm_chunk_kernel(%arg0: i32, %arg1: memref<8x128xf32, #tpu.memory_space<vmem>>, %arg2: memref<1x128xf32, #tpu.memory_space<vmem>>, %arg3: memref<1x128xf32, #tpu.memory_space<vmem>>, %arg4: memref<128x512xf32, #tpu.memory_space<vmem>>, %arg5: memref<128x512xf32, #tpu.memory_space<vmem>>, %arg6: memref<1x512xf32, #tpu.memory_space<vmem>>, %arg7: memref<128x128xf32, #tpu.memory_space<vmem>>, %arg8: memref<1x128xf32, #tpu.memory_space<vmem>>, %arg9: memref<8x128xf32, #tpu.memory_space<vmem>>, %arg10: memref<1x128xf32, #tpu.memory_space<vmem>>, %arg11: memref<1x128xf32, #tpu.memory_space<vmem>>, %arg12: memref<1x128xf32, #tpu.memory_space<vmem>>, %arg13: memref<1x128xf32, #tpu.memory_space<vmem>>, %arg14: memref<8x128xf32, #tpu.memory_space<vmem>>) attributes {dimension_semantics = [#tpu.dimension_semantics<arbitrary>], iteration_bounds = array<i64: 1>, scalar_prefetch = 0 : i64, scratch_operands = 3 : i64, tpu.core_type = #tpu.core_type<tc>, window_params = [{transform_indices = @transform_0, window_bounds = array<i64: 8, 128>}, {pipeline_mode = #tpu.pipeline_mode<synchronous>, transform_indices = @transform_1, window_bounds = array<i64: 1, 128>}, {pipeline_mode = #tpu.pipeline_mode<synchronous>, transform_indices = @transform_2, window_bounds = array<i64: 1, 128>}, {pipeline_mode = #tpu.pipeline_mode<synchronous>, transform_indices = @transform_3, window_bounds = array<i64: 128, 512>}, {pipeline_mode = #tpu.pipeline_mode<synchronous>, transform_indices = @transform_4, window_bounds = array<i64: 128, 512>}, {pipeline_mode = #tpu.pipeline_mode<synchronous>, transform_indices = @transform_5, window_bounds = array<i64: 1, 512>}, {pipeline_mode = #tpu.pipeline_mode<synchronous>, transform_indices = @transform_6, window_bounds = array<i64: 128, 128>}, {pipeline_mode = #tpu.pipeline_mode<synchronous>, transform_indices = @transform_7, window_bounds = array<i64: 1, 128>}, {transform_indices = @transform_8, window_bounds = array<i64: 8, 128>}, {pipeline_mode = #tpu.pipeline_mode<synchronous>, transform_indices = @transform_9, window_bounds = array<i64: 1, 128>}, {pipeline_mode = #tpu.pipeline_mode<synchronous>, transform_indices = @transform_10, window_bounds = array<i64: 1, 128>}]} {
    %c0_i32 = arith.constant 0 : i32
    %0 = arith.cmpi eq, %arg0, %c0_i32 : i32
    %1 = arith.extui %0 : i1 to i32
    %c0_i32_0 = arith.constant 0 : i32
    %2 = arith.cmpi ne, %1, %c0_i32_0 : i32
    scf.if %2 {
      %c0_72 = arith.constant 0 : index
      %c0_73 = arith.constant 0 : index
      %233 = vector.load %arg2[%c0_72, %c0_73] : memref<1x128xf32, #tpu.memory_space<vmem>>, vector<1x128xf32>
      %c0_74 = arith.constant 0 : index
      %c0_75 = arith.constant 0 : index
      %234 = vector.load %arg12[%c0_74, %c0_75] : memref<1x128xf32, #tpu.memory_space<vmem>>, vector<1x128xf32>
      tpu.vector_store %arg12[%c0_74, %c0_75], %233 {strides = array<i32>} : memref<1x128xf32, #tpu.memory_space<vmem>>, vector<1x128xf32>,
      %c0_76 = arith.constant 0 : index
      %c0_77 = arith.constant 0 : index
      %235 = vector.load %arg3[%c0_76, %c0_77] : memref<1x128xf32, #tpu.memory_space<vmem>>, vector<1x128xf32>
      %c0_78 = arith.constant 0 : index
      %c0_79 = arith.constant 0 : index
      %236 = vector.load %arg13[%c0_78, %c0_79] : memref<1x128xf32, #tpu.memory_space<vmem>>, vector<1x128xf32>
      tpu.vector_store %arg13[%c0_78, %c0_79], %235 {strides = array<i32>} : memref<1x128xf32, #tpu.memory_space<vmem>>, vector<1x128xf32>,
    } else {
    }
    %c0 = arith.constant 0 : index
    %c0_1 = arith.constant 0 : index
    %3 = vector.load %arg1[%c0, %c0_1] : memref<8x128xf32, #tpu.memory_space<vmem>>, vector<8x128xf32>
    %c0_2 = arith.constant 0 : index
    %c0_3 = arith.constant 0 : index
    %4 = vector.load %arg4[%c0_2, %c0_3] : memref<128x512xf32, #tpu.memory_space<vmem>>, vector<128x512xf32>
    %cst = arith.constant dense<0.000000e+00> : vector<8x512xf32>
    %5 = tpu.matmul %3, %4, %cst {dimension_numbers = #tpu.dot_dimension_numbers<[1], [0], [0], [1], [0, 0, 1, 1], [], []>} : vector<8x128xf32>, vector<128x512xf32>, vector<8x512xf32> -> vector<8x512xf32>
    %c0_4 = arith.constant 0 : index
    %c0_5 = arith.constant 0 : index
    %6 = vector.load %arg6[%c0_4, %c0_5] : memref<1x512xf32, #tpu.memory_space<vmem>>, vector<1x512xf32>
    %7 = vector.broadcast %6 : vector<1x512xf32> to vector<8x512xf32>
    %8 = arith.addf %5, %7 : vector<8x512xf32>
    %c0_6 = arith.constant 0 : index
    %c0_7 = arith.constant 0 : index
    %9 = vector.load %arg5[%c0_6, %c0_7] : memref<128x512xf32, #tpu.memory_space<vmem>>, vector<128x512xf32>
    %c0_8 = arith.constant 0 : index
    %c0_9 = arith.constant 0 : index
    %10 = vector.load %arg12[%c0_8, %c0_9] : memref<1x128xf32, #tpu.memory_space<vmem>>, vector<1x128xf32>
    %c0_10 = arith.constant 0 : index
    %c0_11 = arith.constant 0 : index
    %11 = vector.load %arg13[%c0_10, %c0_11] : memref<1x128xf32, #tpu.memory_space<vmem>>, vector<1x128xf32>
    %c8_i32 = arith.constant 8 : i32
    %12 = arith.muli %arg0, %c8_i32 : i32
    %c0_i32_12 = arith.constant 0 : i32
    %13 = arith.addi %12, %c0_i32_12 : i32
    %c1_i32 = arith.constant 1 : i32
    %14 = arith.cmpi slt, %13, %c1_i32 : i32
    %15 = vector.extract_strided_slice %8 {offsets = [0, 0], sizes = [1, 512], strides = [1, 1]} : vector<8x512xf32> to vector<1x512xf32>
    %cst_13 = arith.constant dense<0.000000e+00> : vector<1x512xf32>
    %16 = tpu.matmul %10, %9, %cst_13 {dimension_numbers = #tpu.dot_dimension_numbers<[1], [0], [0], [1], [0, 0, 1, 1], [], []>} : vector<1x128xf32>, vector<128x512xf32>, vector<1x512xf32> -> vector<1x512xf32>
    %17 = arith.addf %15, %16 : vector<1x512xf32>
    %18 = vector.extract_strided_slice %17 {offsets = [0, 0], sizes = [1, 384], strides = [1, 1]} : vector<1x512xf32> to vector<1x384xf32>
    %19 = arith.negf %18 : vector<1x384xf32>
    %20 = math.exp %19 : vector<1x384xf32>
    %cst_14 = arith.constant 1.000000e+00 : f32
    %21 = vector.broadcast %cst_14 : f32 to vector<1x384xf32>
    %22 = arith.addf %21, %20 : vector<1x384xf32>
    %23 = arith.divf %21, %22 : vector<1x384xf32>
    %24 = vector.extract_strided_slice %23 {offsets = [0, 0], sizes = [1, 128], strides = [1, 1]} : vector<1x384xf32> to vector<1x128xf32>
    %25 = vector.extract_strided_slice %23 {offsets = [0, 128], sizes = [1, 128], strides = [1, 1]} : vector<1x384xf32> to vector<1x128xf32>
    %26 = vector.extract_strided_slice %23 {offsets = [0, 256], sizes = [1, 128], strides = [1, 1]} : vector<1x384xf32> to vector<1x128xf32>
    %27 = vector.extract_strided_slice %17 {offsets = [0, 384], sizes = [1, 128], strides = [1, 1]} : vector<1x512xf32> to vector<1x128xf32>
    %28 = math.tanh %27 : vector<1x128xf32>
    %29 = arith.mulf %25, %11 : vector<1x128xf32>
    %30 = arith.mulf %24, %28 : vector<1x128xf32>
    %31 = arith.addf %29, %30 : vector<1x128xf32>
    %32 = math.tanh %31 : vector<1x128xf32>
    %33 = arith.mulf %26, %32 : vector<1x128xf32>
    %34 = arith.select %14, %33, %10 : vector<1x128xf32>
    %35 = arith.select %14, %31, %11 : vector<1x128xf32>
    %c0_15 = arith.constant 0 : index
    %c0_16 = arith.constant 0 : index
    %36 = vector.load %arg14[%c0_15, %c0_16] : memref<8x128xf32, #tpu.memory_space<vmem>>, vector<1x128xf32>
    tpu.vector_store %arg14[%c0_15, %c0_16], %34 {strides = array<i32>} : memref<8x128xf32, #tpu.memory_space<vmem>>, vector<1x128xf32>,
    %c8_i32_17 = arith.constant 8 : i32
    %37 = arith.muli %arg0, %c8_i32_17 : i32
    %c1_i32_18 = arith.constant 1 : i32
    %38 = arith.addi %37, %c1_i32_18 : i32
    %c1_i32_19 = arith.constant 1 : i32
    %39 = arith.cmpi slt, %38, %c1_i32_19 : i32
    %40 = vector.extract_strided_slice %8 {offsets = [1, 0], sizes = [1, 512], strides = [1, 1]} : vector<8x512xf32> to vector<1x512xf32>
    %cst_20 = arith.constant dense<0.000000e+00> : vector<1x512xf32>
    %41 = tpu.matmul %34, %9, %cst_20 {dimension_numbers = #tpu.dot_dimension_numbers<[1], [0], [0], [1], [0, 0, 1, 1], [], []>} : vector<1x128xf32>, vector<128x512xf32>, vector<1x512xf32> -> vector<1x512xf32>
    %42 = arith.addf %40, %41 : vector<1x512xf32>
    %43 = vector.extract_strided_slice %42 {offsets = [0, 0], sizes = [1, 384], strides = [1, 1]} : vector<1x512xf32> to vector<1x384xf32>
    %44 = arith.negf %43 : vector<1x384xf32>
    %45 = math.exp %44 : vector<1x384xf32>
    %cst_21 = arith.constant 1.000000e+00 : f32
    %46 = vector.broadcast %cst_21 : f32 to vector<1x384xf32>
    %47 = arith.addf %46, %45 : vector<1x384xf32>
    %48 = arith.divf %46, %47 : vector<1x384xf32>
    %49 = vector.extract_strided_slice %48 {offsets = [0, 0], sizes = [1, 128], strides = [1, 1]} : vector<1x384xf32> to vector<1x128xf32>
    %50 = vector.extract_strided_slice %48 {offsets = [0, 128], sizes = [1, 128], strides = [1, 1]} : vector<1x384xf32> to vector<1x128xf32>
    %51 = vector.extract_strided_slice %48 {offsets = [0, 256], sizes = [1, 128], strides = [1, 1]} : vector<1x384xf32> to vector<1x128xf32>
    %52 = vector.extract_strided_slice %42 {offsets = [0, 384], sizes = [1, 128], strides = [1, 1]} : vector<1x512xf32> to vector<1x128xf32>
    %53 = math.tanh %52 : vector<1x128xf32>
    %54 = arith.mulf %50, %35 : vector<1x128xf32>
    %55 = arith.mulf %49, %53 : vector<1x128xf32>
    %56 = arith.addf %54, %55 : vector<1x128xf32>
    %57 = math.tanh %56 : vector<1x128xf32>
    %58 = arith.mulf %51, %57 : vector<1x128xf32>
    %59 = arith.select %39, %58, %34 : vector<1x128xf32>
    %60 = arith.select %39, %56, %35 : vector<1x128xf32>
    %c1 = arith.constant 1 : index
    %c0_22 = arith.constant 0 : index
    %61 = vector.load %arg14[%c1, %c0_22] : memref<8x128xf32, #tpu.memory_space<vmem>>, vector<1x128xf32>
    tpu.vector_store %arg14[%c1, %c0_22], %59 {strides = array<i32>} : memref<8x128xf32, #tpu.memory_space<vmem>>, vector<1x128xf32>,
    %c8_i32_23 = arith.constant 8 : i32
    %62 = arith.muli %arg0, %c8_i32_23 : i32
    %c2_i32 = arith.constant 2 : i32
    %63 = arith.addi %62, %c2_i32 : i32
    %c1_i32_24 = arith.constant 1 : i32
    %64 = arith.cmpi slt, %63, %c1_i32_24 : i32
    %65 = vector.extract_strided_slice %8 {offsets = [2, 0], sizes = [1, 512], strides = [1, 1]} : vector<8x512xf32> to vector<1x512xf32>
    %cst_25 = arith.constant dense<0.000000e+00> : vector<1x512xf32>
    %66 = tpu.matmul %59, %9, %cst_25 {dimension_numbers = #tpu.dot_dimension_numbers<[1], [0], [0], [1], [0, 0, 1, 1], [], []>} : vector<1x128xf32>, vector<128x512xf32>, vector<1x512xf32> -> vector<1x512xf32>
    %67 = arith.addf %65, %66 : vector<1x512xf32>
    %68 = vector.extract_strided_slice %67 {offsets = [0, 0], sizes = [1, 384], strides = [1, 1]} : vector<1x512xf32> to vector<1x384xf32>
    %69 = arith.negf %68 : vector<1x384xf32>
    %70 = math.exp %69 : vector<1x384xf32>
    %cst_26 = arith.constant 1.000000e+00 : f32
    %71 = vector.broadcast %cst_26 : f32 to vector<1x384xf32>
    %72 = arith.addf %71, %70 : vector<1x384xf32>
    %73 = arith.divf %71, %72 : vector<1x384xf32>
    %74 = vector.extract_strided_slice %73 {offsets = [0, 0], sizes = [1, 128], strides = [1, 1]} : vector<1x384xf32> to vector<1x128xf32>
    %75 = vector.extract_strided_slice %73 {offsets = [0, 128], sizes = [1, 128], strides = [1, 1]} : vector<1x384xf32> to vector<1x128xf32>
    %76 = vector.extract_strided_slice %73 {offsets = [0, 256], sizes = [1, 128], strides = [1, 1]} : vector<1x384xf32> to vector<1x128xf32>
    %77 = vector.extract_strided_slice %67 {offsets = [0, 384], sizes = [1, 128], strides = [1, 1]} : vector<1x512xf32> to vector<1x128xf32>
    %78 = math.tanh %77 : vector<1x128xf32>
    %79 = arith.mulf %75, %60 : vector<1x128xf32>
    %80 = arith.mulf %74, %78 : vector<1x128xf32>
    %81 = arith.addf %79, %80 : vector<1x128xf32>
    %82 = math.tanh %81 : vector<1x128xf32>
    %83 = arith.mulf %76, %82 : vector<1x128xf32>
    %84 = arith.select %64, %83, %59 : vector<1x128xf32>
    %85 = arith.select %64, %81, %60 : vector<1x128xf32>
    %c2 = arith.constant 2 : index
    %c0_27 = arith.constant 0 : index
    %86 = vector.load %arg14[%c2, %c0_27] : memref<8x128xf32, #tpu.memory_space<vmem>>, vector<1x128xf32>
    tpu.vector_store %arg14[%c2, %c0_27], %84 {strides = array<i32>} : memref<8x128xf32, #tpu.memory_space<vmem>>, vector<1x128xf32>,
    %c8_i32_28 = arith.constant 8 : i32
    %87 = arith.muli %arg0, %c8_i32_28 : i32
    %c3_i32 = arith.constant 3 : i32
    %88 = arith.addi %87, %c3_i32 : i32
    %c1_i32_29 = arith.constant 1 : i32
    %89 = arith.cmpi slt, %88, %c1_i32_29 : i32
    %90 = vector.extract_strided_slice %8 {offsets = [3, 0], sizes = [1, 512], strides = [1, 1]} : vector<8x512xf32> to vector<1x512xf32>
    %cst_30 = arith.constant dense<0.000000e+00> : vector<1x512xf32>
    %91 = tpu.matmul %84, %9, %cst_30 {dimension_numbers = #tpu.dot_dimension_numbers<[1], [0], [0], [1], [0, 0, 1, 1], [], []>} : vector<1x128xf32>, vector<128x512xf32>, vector<1x512xf32> -> vector<1x512xf32>
    %92 = arith.addf %90, %91 : vector<1x512xf32>
    %93 = vector.extract_strided_slice %92 {offsets = [0, 0], sizes = [1, 384], strides = [1, 1]} : vector<1x512xf32> to vector<1x384xf32>
    %94 = arith.negf %93 : vector<1x384xf32>
    %95 = math.exp %94 : vector<1x384xf32>
    %cst_31 = arith.constant 1.000000e+00 : f32
    %96 = vector.broadcast %cst_31 : f32 to vector<1x384xf32>
    %97 = arith.addf %96, %95 : vector<1x384xf32>
    %98 = arith.divf %96, %97 : vector<1x384xf32>
    %99 = vector.extract_strided_slice %98 {offsets = [0, 0], sizes = [1, 128], strides = [1, 1]} : vector<1x384xf32> to vector<1x128xf32>
    %100 = vector.extract_strided_slice %98 {offsets = [0, 128], sizes = [1, 128], strides = [1, 1]} : vector<1x384xf32> to vector<1x128xf32>
    %101 = vector.extract_strided_slice %98 {offsets = [0, 256], sizes = [1, 128], strides = [1, 1]} : vector<1x384xf32> to vector<1x128xf32>
    %102 = vector.extract_strided_slice %92 {offsets = [0, 384], sizes = [1, 128], strides = [1, 1]} : vector<1x512xf32> to vector<1x128xf32>
    %103 = math.tanh %102 : vector<1x128xf32>
    %104 = arith.mulf %100, %85 : vector<1x128xf32>
    %105 = arith.mulf %99, %103 : vector<1x128xf32>
    %106 = arith.addf %104, %105 : vector<1x128xf32>
    %107 = math.tanh %106 : vector<1x128xf32>
    %108 = arith.mulf %101, %107 : vector<1x128xf32>
    %109 = arith.select %89, %108, %84 : vector<1x128xf32>
    %110 = arith.select %89, %106, %85 : vector<1x128xf32>
    %c3 = arith.constant 3 : index
    %c0_32 = arith.constant 0 : index
    %111 = vector.load %arg14[%c3, %c0_32] : memref<8x128xf32, #tpu.memory_space<vmem>>, vector<1x128xf32>
    tpu.vector_store %arg14[%c3, %c0_32], %109 {strides = array<i32>} : memref<8x128xf32, #tpu.memory_space<vmem>>, vector<1x128xf32>,
    %c8_i32_33 = arith.constant 8 : i32
    %112 = arith.muli %arg0, %c8_i32_33 : i32
    %c4_i32 = arith.constant 4 : i32
    %113 = arith.addi %112, %c4_i32 : i32
    %c1_i32_34 = arith.constant 1 : i32
    %114 = arith.cmpi slt, %113, %c1_i32_34 : i32
    %115 = vector.extract_strided_slice %8 {offsets = [4, 0], sizes = [1, 512], strides = [1, 1]} : vector<8x512xf32> to vector<1x512xf32>
    %cst_35 = arith.constant dense<0.000000e+00> : vector<1x512xf32>
    %116 = tpu.matmul %109, %9, %cst_35 {dimension_numbers = #tpu.dot_dimension_numbers<[1], [0], [0], [1], [0, 0, 1, 1], [], []>} : vector<1x128xf32>, vector<128x512xf32>, vector<1x512xf32> -> vector<1x512xf32>
    %117 = arith.addf %115, %116 : vector<1x512xf32>
    %118 = vector.extract_strided_slice %117 {offsets = [0, 0], sizes = [1, 384], strides = [1, 1]} : vector<1x512xf32> to vector<1x384xf32>
    %119 = arith.negf %118 : vector<1x384xf32>
    %120 = math.exp %119 : vector<1x384xf32>
    %cst_36 = arith.constant 1.000000e+00 : f32
    %121 = vector.broadcast %cst_36 : f32 to vector<1x384xf32>
    %122 = arith.addf %121, %120 : vector<1x384xf32>
    %123 = arith.divf %121, %122 : vector<1x384xf32>
    %124 = vector.extract_strided_slice %123 {offsets = [0, 0], sizes = [1, 128], strides = [1, 1]} : vector<1x384xf32> to vector<1x128xf32>
    %125 = vector.extract_strided_slice %123 {offsets = [0, 128], sizes = [1, 128], strides = [1, 1]} : vector<1x384xf32> to vector<1x128xf32>
    %126 = vector.extract_strided_slice %123 {offsets = [0, 256], sizes = [1, 128], strides = [1, 1]} : vector<1x384xf32> to vector<1x128xf32>
    %127 = vector.extract_strided_slice %117 {offsets = [0, 384], sizes = [1, 128], strides = [1, 1]} : vector<1x512xf32> to vector<1x128xf32>
    %128 = math.tanh %127 : vector<1x128xf32>
    %129 = arith.mulf %125, %110 : vector<1x128xf32>
    %130 = arith.mulf %124, %128 : vector<1x128xf32>
    %131 = arith.addf %129, %130 : vector<1x128xf32>
    %132 = math.tanh %131 : vector<1x128xf32>
    %133 = arith.mulf %126, %132 : vector<1x128xf32>
    %134 = arith.select %114, %133, %109 : vector<1x128xf32>
    %135 = arith.select %114, %131, %110 : vector<1x128xf32>
    %c4 = arith.constant 4 : index
    %c0_37 = arith.constant 0 : index
    %136 = vector.load %arg14[%c4, %c0_37] : memref<8x128xf32, #tpu.memory_space<vmem>>, vector<1x128xf32>
    tpu.vector_store %arg14[%c4, %c0_37], %134 {strides = array<i32>} : memref<8x128xf32, #tpu.memory_space<vmem>>, vector<1x128xf32>,
    %c8_i32_38 = arith.constant 8 : i32
    %137 = arith.muli %arg0, %c8_i32_38 : i32
    %c5_i32 = arith.constant 5 : i32
    %138 = arith.addi %137, %c5_i32 : i32
    %c1_i32_39 = arith.constant 1 : i32
    %139 = arith.cmpi slt, %138, %c1_i32_39 : i32
    %140 = vector.extract_strided_slice %8 {offsets = [5, 0], sizes = [1, 512], strides = [1, 1]} : vector<8x512xf32> to vector<1x512xf32>
    %cst_40 = arith.constant dense<0.000000e+00> : vector<1x512xf32>
    %141 = tpu.matmul %134, %9, %cst_40 {dimension_numbers = #tpu.dot_dimension_numbers<[1], [0], [0], [1], [0, 0, 1, 1], [], []>} : vector<1x128xf32>, vector<128x512xf32>, vector<1x512xf32> -> vector<1x512xf32>
    %142 = arith.addf %140, %141 : vector<1x512xf32>
    %143 = vector.extract_strided_slice %142 {offsets = [0, 0], sizes = [1, 384], strides = [1, 1]} : vector<1x512xf32> to vector<1x384xf32>
    %144 = arith.negf %143 : vector<1x384xf32>
    %145 = math.exp %144 : vector<1x384xf32>
    %cst_41 = arith.constant 1.000000e+00 : f32
    %146 = vector.broadcast %cst_41 : f32 to vector<1x384xf32>
    %147 = arith.addf %146, %145 : vector<1x384xf32>
    %148 = arith.divf %146, %147 : vector<1x384xf32>
    %149 = vector.extract_strided_slice %148 {offsets = [0, 0], sizes = [1, 128], strides = [1, 1]} : vector<1x384xf32> to vector<1x128xf32>
    %150 = vector.extract_strided_slice %148 {offsets = [0, 128], sizes = [1, 128], strides = [1, 1]} : vector<1x384xf32> to vector<1x128xf32>
    %151 = vector.extract_strided_slice %148 {offsets = [0, 256], sizes = [1, 128], strides = [1, 1]} : vector<1x384xf32> to vector<1x128xf32>
    %152 = vector.extract_strided_slice %142 {offsets = [0, 384], sizes = [1, 128], strides = [1, 1]} : vector<1x512xf32> to vector<1x128xf32>
    %153 = math.tanh %152 : vector<1x128xf32>
    %154 = arith.mulf %150, %135 : vector<1x128xf32>
    %155 = arith.mulf %149, %153 : vector<1x128xf32>
    %156 = arith.addf %154, %155 : vector<1x128xf32>
    %157 = math.tanh %156 : vector<1x128xf32>
    %158 = arith.mulf %151, %157 : vector<1x128xf32>
    %159 = arith.select %139, %158, %134 : vector<1x128xf32>
    %160 = arith.select %139, %156, %135 : vector<1x128xf32>
    %c5 = arith.constant 5 : index
    %c0_42 = arith.constant 0 : index
    %161 = vector.load %arg14[%c5, %c0_42] : memref<8x128xf32, #tpu.memory_space<vmem>>, vector<1x128xf32>
    tpu.vector_store %arg14[%c5, %c0_42], %159 {strides = array<i32>} : memref<8x128xf32, #tpu.memory_space<vmem>>, vector<1x128xf32>,
    %c8_i32_43 = arith.constant 8 : i32
    %162 = arith.muli %arg0, %c8_i32_43 : i32
    %c6_i32 = arith.constant 6 : i32
    %163 = arith.addi %162, %c6_i32 : i32
    %c1_i32_44 = arith.constant 1 : i32
    %164 = arith.cmpi slt, %163, %c1_i32_44 : i32
    %165 = vector.extract_strided_slice %8 {offsets = [6, 0], sizes = [1, 512], strides = [1, 1]} : vector<8x512xf32> to vector<1x512xf32>
    %cst_45 = arith.constant dense<0.000000e+00> : vector<1x512xf32>
    %166 = tpu.matmul %159, %9, %cst_45 {dimension_numbers = #tpu.dot_dimension_numbers<[1], [0], [0], [1], [0, 0, 1, 1], [], []>} : vector<1x128xf32>, vector<128x512xf32>, vector<1x512xf32> -> vector<1x512xf32>
    %167 = arith.addf %165, %166 : vector<1x512xf32>
    %168 = vector.extract_strided_slice %167 {offsets = [0, 0], sizes = [1, 384], strides = [1, 1]} : vector<1x512xf32> to vector<1x384xf32>
    %169 = arith.negf %168 : vector<1x384xf32>
    %170 = math.exp %169 : vector<1x384xf32>
    %cst_46 = arith.constant 1.000000e+00 : f32
    %171 = vector.broadcast %cst_46 : f32 to vector<1x384xf32>
    %172 = arith.addf %171, %170 : vector<1x384xf32>
    %173 = arith.divf %171, %172 : vector<1x384xf32>
    %174 = vector.extract_strided_slice %173 {offsets = [0, 0], sizes = [1, 128], strides = [1, 1]} : vector<1x384xf32> to vector<1x128xf32>
    %175 = vector.extract_strided_slice %173 {offsets = [0, 128], sizes = [1, 128], strides = [1, 1]} : vector<1x384xf32> to vector<1x128xf32>
    %176 = vector.extract_strided_slice %173 {offsets = [0, 256], sizes = [1, 128], strides = [1, 1]} : vector<1x384xf32> to vector<1x128xf32>
    %177 = vector.extract_strided_slice %167 {offsets = [0, 384], sizes = [1, 128], strides = [1, 1]} : vector<1x512xf32> to vector<1x128xf32>
    %178 = math.tanh %177 : vector<1x128xf32>
    %179 = arith.mulf %175, %160 : vector<1x128xf32>
    %180 = arith.mulf %174, %178 : vector<1x128xf32>
    %181 = arith.addf %179, %180 : vector<1x128xf32>
    %182 = math.tanh %181 : vector<1x128xf32>
    %183 = arith.mulf %176, %182 : vector<1x128xf32>
    %184 = arith.select %164, %183, %159 : vector<1x128xf32>
    %185 = arith.select %164, %181, %160 : vector<1x128xf32>
    %c6 = arith.constant 6 : index
    %c0_47 = arith.constant 0 : index
    %186 = vector.load %arg14[%c6, %c0_47] : memref<8x128xf32, #tpu.memory_space<vmem>>, vector<1x128xf32>
    tpu.vector_store %arg14[%c6, %c0_47], %184 {strides = array<i32>} : memref<8x128xf32, #tpu.memory_space<vmem>>, vector<1x128xf32>,
    %c8_i32_48 = arith.constant 8 : i32
    %187 = arith.muli %arg0, %c8_i32_48 : i32
    %c7_i32 = arith.constant 7 : i32
    %188 = arith.addi %187, %c7_i32 : i32
    %c1_i32_49 = arith.constant 1 : i32
    %189 = arith.cmpi slt, %188, %c1_i32_49 : i32
    %190 = vector.extract_strided_slice %8 {offsets = [7, 0], sizes = [1, 512], strides = [1, 1]} : vector<8x512xf32> to vector<1x512xf32>
    %cst_50 = arith.constant dense<0.000000e+00> : vector<1x512xf32>
    %191 = tpu.matmul %184, %9, %cst_50 {dimension_numbers = #tpu.dot_dimension_numbers<[1], [0], [0], [1], [0, 0, 1, 1], [], []>} : vector<1x128xf32>, vector<128x512xf32>, vector<1x512xf32> -> vector<1x512xf32>
    %192 = arith.addf %190, %191 : vector<1x512xf32>
    %193 = vector.extract_strided_slice %192 {offsets = [0, 0], sizes = [1, 384], strides = [1, 1]} : vector<1x512xf32> to vector<1x384xf32>
    %194 = arith.negf %193 : vector<1x384xf32>
    %195 = math.exp %194 : vector<1x384xf32>
    %cst_51 = arith.constant 1.000000e+00 : f32
    %196 = vector.broadcast %cst_51 : f32 to vector<1x384xf32>
    %197 = arith.addf %196, %195 : vector<1x384xf32>
    %198 = arith.divf %196, %197 : vector<1x384xf32>
    %199 = vector.extract_strided_slice %198 {offsets = [0, 0], sizes = [1, 128], strides = [1, 1]} : vector<1x384xf32> to vector<1x128xf32>
    %200 = vector.extract_strided_slice %198 {offsets = [0, 128], sizes = [1, 128], strides = [1, 1]} : vector<1x384xf32> to vector<1x128xf32>
    %201 = vector.extract_strided_slice %198 {offsets = [0, 256], sizes = [1, 128], strides = [1, 1]} : vector<1x384xf32> to vector<1x128xf32>
    %202 = vector.extract_strided_slice %192 {offsets = [0, 384], sizes = [1, 128], strides = [1, 1]} : vector<1x512xf32> to vector<1x128xf32>
    %203 = math.tanh %202 : vector<1x128xf32>
    %204 = arith.mulf %200, %185 : vector<1x128xf32>
    %205 = arith.mulf %199, %203 : vector<1x128xf32>
    %206 = arith.addf %204, %205 : vector<1x128xf32>
    %207 = math.tanh %206 : vector<1x128xf32>
    %208 = arith.mulf %201, %207 : vector<1x128xf32>
    %209 = arith.select %189, %208, %184 : vector<1x128xf32>
    %210 = arith.select %189, %206, %185 : vector<1x128xf32>
    %c7 = arith.constant 7 : index
    %c0_52 = arith.constant 0 : index
    %211 = vector.load %arg14[%c7, %c0_52] : memref<8x128xf32, #tpu.memory_space<vmem>>, vector<1x128xf32>
    tpu.vector_store %arg14[%c7, %c0_52], %209 {strides = array<i32>} : memref<8x128xf32, #tpu.memory_space<vmem>>, vector<1x128xf32>,
    %c0_53 = arith.constant 0 : index
    %c0_54 = arith.constant 0 : index
    %212 = vector.load %arg12[%c0_53, %c0_54] : memref<1x128xf32, #tpu.memory_space<vmem>>, vector<1x128xf32>
    tpu.vector_store %arg12[%c0_53, %c0_54], %209 {strides = array<i32>} : memref<1x128xf32, #tpu.memory_space<vmem>>, vector<1x128xf32>,
    %c0_55 = arith.constant 0 : index
    %c0_56 = arith.constant 0 : index
    %213 = vector.load %arg13[%c0_55, %c0_56] : memref<1x128xf32, #tpu.memory_space<vmem>>, vector<1x128xf32>
    tpu.vector_store %arg13[%c0_55, %c0_56], %210 {strides = array<i32>} : memref<1x128xf32, #tpu.memory_space<vmem>>, vector<1x128xf32>,
    %c0_57 = arith.constant 0 : index
    %c0_58 = arith.constant 0 : index
    %214 = vector.load %arg14[%c0_57, %c0_58] : memref<8x128xf32, #tpu.memory_space<vmem>>, vector<8x128xf32>
    %c0_59 = arith.constant 0 : index
    %c0_60 = arith.constant 0 : index
    %215 = vector.load %arg7[%c0_59, %c0_60] : memref<128x128xf32, #tpu.memory_space<vmem>>, vector<128x128xf32>
    %cst_61 = arith.constant dense<0.000000e+00> : vector<8x128xf32>
    %216 = tpu.matmul %214, %215, %cst_61 {dimension_numbers = #tpu.dot_dimension_numbers<[1], [0], [0], [1], [0, 0, 1, 1], [], []>} : vector<8x128xf32>, vector<128x128xf32>, vector<8x128xf32> -> vector<8x128xf32>
    %c0_62 = arith.constant 0 : index
    %c0_63 = arith.constant 0 : index
    %217 = vector.load %arg8[%c0_62, %c0_63] : memref<1x128xf32, #tpu.memory_space<vmem>>, vector<1x128xf32>
    %218 = vector.broadcast %217 : vector<1x128xf32> to vector<8x128xf32>
    %219 = arith.addf %216, %218 : vector<8x128xf32>
    %cst_64 = arith.constant dense<0xFF800000> : vector<8xf32>
    %220 = vector.multi_reduction <maximumf>, %219, %cst_64 [1] : vector<8x128xf32> to vector<8xf32>
    %221 = vector.shape_cast %220 : vector<8xf32> to vector<8x1xf32>
    %222 = vector.broadcast %221 : vector<8x1xf32> to vector<8x128xf32>
    %223 = arith.subf %219, %222 : vector<8x128xf32>
    %224 = math.exp %223 : vector<8x128xf32>
    %cst_65 = arith.constant dense<0.000000e+00> : vector<8xf32>
    %225 = vector.multi_reduction <add>, %224, %cst_65 [1] : vector<8x128xf32> to vector<8xf32>
    %226 = vector.shape_cast %225 : vector<8xf32> to vector<8x1xf32>
    %227 = tpu.reciprocal %226 {approx = true} : vector<8x1xf32> -> vector<8x1xf32>
    %228 = vector.broadcast %227 : vector<8x1xf32> to vector<8x128xf32>
    %229 = arith.mulf %224, %228 : vector<8x128xf32>
    %c0_66 = arith.constant 0 : index
    %c0_67 = arith.constant 0 : index
    %230 = vector.load %arg9[%c0_66, %c0_67] : memref<8x128xf32, #tpu.memory_space<vmem>>, vector<8x128xf32>
    tpu.vector_store %arg9[%c0_66, %c0_67], %229 {strides = array<i32>} : memref<8x128xf32, #tpu.memory_space<vmem>>, vector<8x128xf32>,
    %c0_68 = arith.constant 0 : index
    %c0_69 = arith.constant 0 : index
    %231 = vector.load %arg10[%c0_68, %c0_69] : memref<1x128xf32, #tpu.memory_space<vmem>>, vector<1x128xf32>
    tpu.vector_store %arg10[%c0_68, %c0_69], %209 {strides = array<i32>} : memref<1x128xf32, #tpu.memory_space<vmem>>, vector<1x128xf32>,
    %c0_70 = arith.constant 0 : index
    %c0_71 = arith.constant 0 : index
    %232 = vector.load %arg11[%c0_70, %c0_71] : memref<1x128xf32, #tpu.memory_space<vmem>>, vector<1x128xf32>
    tpu.vector_store %arg11[%c0_70, %c0_71], %210 {strides = array<i32>} : memref<1x128xf32, #tpu.memory_space<vmem>>, vector<1x128xf32>,
    return
  }
  func.func @transform_0(%arg0: i32) -> (i32, i32) {
    %c0_i32 = arith.constant 0 : i32
    %c0_i32_0 = arith.constant 0 : i32
    return %arg0, %c0_i32 : i32, i32
  }
  func.func @transform_1(%arg0: i32) -> (i32, i32) {
    %c0_i32 = arith.constant 0 : i32
    %c0_i32_0 = arith.constant 0 : i32
    %c0_i32_1 = arith.constant 0 : i32
    return %c0_i32, %c0_i32_0 : i32, i32
  }
  func.func @transform_2(%arg0: i32) -> (i32, i32) {
    %c0_i32 = arith.constant 0 : i32
    %c0_i32_0 = arith.constant 0 : i32
    %c0_i32_1 = arith.constant 0 : i32
    return %c0_i32, %c0_i32_0 : i32, i32
  }
  func.func @transform_3(%arg0: i32) -> (i32, i32) {
    %c0_i32 = arith.constant 0 : i32
    %c0_i32_0 = arith.constant 0 : i32
    %c0_i32_1 = arith.constant 0 : i32
    return %c0_i32, %c0_i32_0 : i32, i32
  }
  func.func @transform_4(%arg0: i32) -> (i32, i32) {
    %c0_i32 = arith.constant 0 : i32
    %c0_i32_0 = arith.constant 0 : i32
    %c0_i32_1 = arith.constant 0 : i32
    return %c0_i32, %c0_i32_0 : i32, i32
  }
  func.func @transform_5(%arg0: i32) -> (i32, i32) {
    %c0_i32 = arith.constant 0 : i32
    %c0_i32_0 = arith.constant 0 : i32
    %c0_i32_1 = arith.constant 0 : i32
    return %c0_i32, %c0_i32_0 : i32, i32
  }
  func.func @transform_6(%arg0: i32) -> (i32, i32) {
    %c0_i32 = arith.constant 0 : i32
    %c0_i32_0 = arith.constant 0 : i32
    %c0_i32_1 = arith.constant 0 : i32
    return %c0_i32, %c0_i32_0 : i32, i32
  }
  func.func @transform_7(%arg0: i32) -> (i32, i32) {
    %c0_i32 = arith.constant 0 : i32
    %c0_i32_0 = arith.constant 0 : i32
    %c0_i32_1 = arith.constant 0 : i32
    return %c0_i32, %c0_i32_0 : i32, i32
  }
  func.func @transform_8(%arg0: i32) -> (i32, i32) {
    %c0_i32 = arith.constant 0 : i32
    %c0_i32_0 = arith.constant 0 : i32
    return %arg0, %c0_i32 : i32, i32
  }
  func.func @transform_9(%arg0: i32) -> (i32, i32) {
    %c0_i32 = arith.constant 0 : i32
    %c0_i32_0 = arith.constant 0 : i32
    %c0_i32_1 = arith.constant 0 : i32
    return %c0_i32, %c0_i32_0 : i32, i32
  }
  func.func @transform_10(%arg0: i32) -> (i32, i32) {
    %c0_i32 = arith.constant 0 : i32
    %c0_i32_0 = arith.constant 0 : i32
    %c0_i32_1 = arith.constant 0 : i32
    return %c0_i32, %c0_i32_0 : i32, i32
  }
}

</mosaic_0001>

<bundles_post_ra>
// kernel: tpu_custom_call.1
= control target key start
LH: loop header
LB: loop body
LE: loop exit
PB: predicated region body
PF: predicated region fallthrough
CT: control target
= control target key end

     0   :  { %16 = vsyncpa [#allocation6], 0  ;;  %s3352_s0 = inlined_call_operand.vmem [shape: f32[8,128], index: 0, kind: input, shape index: {}]   ;;  %s3353_s1 = inlined_call_operand.hbm [shape: f32[1,128], index: 1, kind: input, shape index: {}, may-alias: {1,9}]   ;;  %s3354_s2 = inlined_call_operand.hbm [shape: f32[1,128], index: 2, kind: input, shape index: {}, may-alias: {2,10}]   ;;  %s3355_s3 = inlined_call_operand.hbm [shape: f32[128,512], index: 3, kind: input, shape index: {}]   ;;  %s3356_s4 = inlined_call_operand.hbm [shape: f32[128,512], index: 4, kind: input, shape index: {}]   ;;  %s3357_s5 = inlined_call_operand.vmem [shape: f32[1,512], index: 5, kind: input, shape index: {}]   ;;  %s3358_s6 = inlined_call_operand.hbm [shape: f32[128,128], index: 6, kind: input, shape index: {}]   ;;  %s3359_s7 = inlined_call_operand.vmem [shape: f32[1,128], index: 7, kind: input, shape index: {}]   ;;  %s3360_s8 = inlined_call_operand.hbm [shape: f32[8,128], index: 8, kind: output, shape index: {0}]   ;;  %s3361_s9 = inlined_call_operand.hbm [shape: f32[1,128], index: 9, kind: output, shape index: {1}, may-alias: {1,9}]   ;;  %s3362_s10 = inlined_call_operand.hbm [shape: f32[1,128], index: 10, kind: output, shape index: {2}, may-alias: {2,10}]  }
   0x1   :  { %17 = vsyncpa [#allocation9], 0 }
   0x2   :  { %18 = vsyncpa [#allocation12], 0 }
   0x3   :  { %19 = vsyncpa [#allocation7], 0 }
   0x4   :  { %20 = vsyncpa [#allocation16], 0  ;;  %s2465_s13 = smov [#allocation8]  }
   0x5   :  { %s39_s14 = sshll.u32 %s2465_s13, 4  ;;  %s40_s14 = int_to_ptr.vmem [resolvable:$true] %s39_s14 }
   0x6   :  { %s2303_s15 = scalar_lea.vmem %s40_s14, 16  ;;  %s2307_s16 = scalar_lea.vmem %s40_s14, 32 }
   0x7   :  { %p2304_p0 = scmp.ne.s32.totalorder %s40_s14, %s2303_s15  ;;  %p2308_p1 = scmp.lt.s32.totalorder %s40_s14, %s40_s14 }
   0x8   :  { %p2309_p2 = scmp.lt.s32.totalorder %s2307_s16, %s2303_s15 }
   0xa   :  { %p2310_p3 = por %p2309_p2, %p2308_p1 }
   0xc   :  { %p2311_p4 = pnand %p2310_p3, %p2304_p0 }
   0xe   :  { %2314 = shalt.err (!%p2311_p4)
}
   0xf   :  { %42 = dma.hbm_to_vmem [thread:$0]  %s3354_s2, 16, %s40_s14, [#allocation9]  }
  0x10   :  { %s2466_s19 = smov [#allocation11]   ;;  %s2467_s21 = smov [#allocation5]  }
  0x11   :  { %s60_s20 = sshll.u32 %s2466_s19, 4  ;;  %s29_s22 = sshll.u32 %s2467_s21, 4  ;;  %s61_s20 = int_to_ptr.vmem [resolvable:$true] %s60_s20  ;;  %s30_s22 = int_to_ptr.vmem [resolvable:$true] %s29_s22 }
  0x12   :  { %s2323_s23 = scalar_lea.vmem %s61_s20, 8192  ;;  %p2328_p6 = scmp.lt.s32.totalorder %s61_s20, %s61_s20 }
  0x13   :  { %p2324_p5 = scmp.ne.s32.totalorder %s61_s20, %s2323_s23  ;;  %p2329_p7 = scmp.lt.s32.totalorder %s2323_s23, %s2323_s23 }
  0x15   :  { %p2330_p8 = por %p2329_p7, %p2328_p6 }
  0x17   :  { %p2331_p9 = pnand %p2330_p8, %p2324_p5 }
  0x19   :  { %2334 = shalt.err (!%p2331_p9)
}
  0x1a   :  { %s2468_s24 = smov 512   ;;  %s2469_s25 = smov 32  }
  0x1b   :  { %66 = dma.hbm_to_vmem [thread:$0]  %s3356_s4, 8192, %s61_s20, [#allocation12], %s2468_s24, %s2468_s24, %s2469_s25  }
  0x1c   :  { %s2343_s2 = scalar_lea.vmem %s30_s22, 16  ;;  %s2347_s28 = scalar_lea.vmem %s30_s22, 32 }
  0x1d   :  { %p2344_p10 = scmp.ne.s32.totalorder %s30_s22, %s2343_s2  ;;  %p2348_p11 = scmp.lt.s32.totalorder %s30_s22, %s30_s22 }
  0x1e   :  { %p2349_p12 = scmp.lt.s32.totalorder %s2347_s28, %s2343_s2 }
  0x20   :  { %p2350_p13 = por %p2349_p12, %p2348_p11 }
  0x22   :  { %p2351_p0 = pnand %p2350_p13, %p2344_p10 }
  0x24   :  { %2354 = shalt.err (!%p2351_p0)
}
  0x25   :  { %32 = dma.hbm_to_vmem [thread:$0]  %s3353_s1, 16, %s30_s22, [#allocation6]  }
  0x26   :  { %s2470_s11 = smov [#allocation10]   ;;  %s2471_s13 = smov [#allocation13]  }
  0x27   :  { %s48_s12 = sshll.u32 %s2470_s11, 4  ;;  %s74_s14 = sshll.u32 %s2471_s13, 4  ;;  %s49_s12 = int_to_ptr.vmem [resolvable:$true] %s48_s12  ;;  %s75_s14 = int_to_ptr.vmem [resolvable:$true] %s74_s14 }
  0x28   :  { %s2363_s15 = scalar_lea.vmem %s49_s12, 8192  ;;  %p2368_p2 = scmp.lt.s32.totalorder %s49_s12, %s49_s12 }
  0x29   :  { %p2364_p1 = scmp.ne.s32.totalorder %s49_s12, %s2363_s15  ;;  %p2369_p3 = scmp.lt.s32.totalorder %s2363_s15, %s2363_s15 }
  0x2b   :  { %p2370_p4 = por %p2369_p3, %p2368_p2 }
  0x2d   :  { %p2371_p5 = pnand %p2370_p4, %p2364_p1 }
  0x2f   :  { %2374 = shalt.err (!%p2371_p5)
}
  0x30   :  { %54 = dma.hbm_to_vmem [thread:$0]  %s3355_s3, 8192, %s49_s12, [#allocation9], %s2468_s24, %s2468_s24, %s2469_s25  }
  0x31   :  { %s2383_s17 = scalar_lea.vmem %s75_s14, 2048  ;;  %p2388_p7 = scmp.lt.s32.totalorder %s75_s14, %s75_s14 }
  0x32   :  { %p2384_p6 = scmp.ne.s32.totalorder %s75_s14, %s2383_s17  ;;  %p2389_p8 = scmp.lt.s32.totalorder %s2383_s17, %s2383_s17 }
  0x34   :  { %p2390_p9 = por %p2389_p8, %p2388_p7 }
  0x36   :  { %p2391_p10 = pnand %p2390_p9, %p2384_p6 }
  0x38   :  { %2394 = shalt.err (!%p2391_p10)
}
  0x39   :  { %s2472_s1 = smov 128   ;;  %s2473_s18 = smov 8  }
  0x3a   :  { %80 = dma.hbm_to_vmem [thread:$0]  %s3358_s6, 2048, %s75_s14, [#allocation12], %s2472_s1, %s2472_s1, %s2473_s18  }
  0x3b   :  { %2455 = dma.done.wait [#allocation6], 16  }
  0x3c   :  { %2456 = vsyncadd [#allocation6], 4294967280 }
  0x3d   :  { %2457 = dma.done.wait [#allocation9], 8208  }
  0x3e   :  { %2458 = vsyncadd [#allocation9], 4294959088 }
  0x3f   :  { %2459 = dma.done.wait [#allocation12], 10240  }
  0x40   :  { %2460 = vsyncadd [#allocation12], 4294957056  ;;  %v3363_v0 = vmov 0.0   ;;  %v168_v1 = vld [vmem:[#allocation10 + $0x1e8] sm:$0xff]  ;;  %v170_v2 = vld [vmem:[#allocation10 + $0x1f8] sm:$0xff]  ;;  %vm2475_vm0 = vmmov 0  }
  0x41   :  { %257 = vmatprep.mubr.f32.mxu0 %v3363_v0  ;;  %328 = vmatprep.mubr.f32.mxu1 %v3363_v0  ;;  %v167_v3 = vld [vmem:[#allocation10 + $0x1e0] sm:$0xff]  ;;  %v169_v4 = vld [vmem:[#allocation10 + $0x1f0] sm:$0xff]  ;;  %v164_v5 = vld [vmem:[#allocation10 + $0x1c8] sm:$0xff]  ;;  %s2476_s23 = smov [#allocation15]  }
  0x42   :  { %193 = vmatprep.subr.mxu0 %v168_v1  ;;  %264 = vmatprep.subr.mxu1 %v170_v2  ;;  %v166_v6 = vld [vmem:[#allocation10 + $0x1d8] sm:$0xff]  ;;  %v163_v7 = vld [vmem:[#allocation10 + $0x1c0] sm:$0xff]  ;;  %v165_v8 = vld [vmem:[#allocation10 + $0x1d0] sm:$0xff]  ;;  %s2087_s24 = sshll.u32 %s2476_s23, 4  ;;  %s2088_s24 = int_to_ptr.vmem [resolvable:$true] %s2087_s24 }
  0x43   :  { %194 = vmatpush1.msra.mxu0 %v167_v3  ;;  %265 = vmatpush1.msra.mxu1 %v169_v4  ;;  %v160_v9 = vld [vmem:[#allocation10 + $0x1a8] sm:$0xff]  ;;  %v162_v10 = vld [vmem:[#allocation10 + $0x1b8] sm:$0xff]  ;;  %v159_v11 = vld [vmem:[#allocation10 + $0x1a0] sm:$0xff]  ;;  %s2395_s25 = scalar_lea.vmem %s2088_s24, 16  ;;  %s2399_s26 = scalar_lea.vmem %s2088_s24, 32 }
  0x44   :  { %195 = vmatprep.subr.mxu0 %v164_v5  ;;  %266 = vmatprep.subr.mxu1 %v166_v6  ;;  %v161_v12 = vld [vmem:[#allocation10 + $0x1b0] sm:$0xff]  ;;  %v156_v13 = vld [vmem:[#allocation10 + $0x188] sm:$0xff]  ;;  %v158_v14 = vld [vmem:[#allocation10 + $0x198] sm:$0xff]  ;;  %p2396_p11 = scmp.ne.s32.totalorder %s2088_s24, %s2395_s25  ;;  %p2400_p12 = scmp.lt.s32.totalorder %s2088_s24, %s2088_s24 }
  0x45   :  { %196 = vmatpush1.msra.mxu0 %v163_v7  ;;  %267 = vmatpush1.msra.mxu1 %v165_v8  ;;  %v155_v15 = vld [vmem:[#allocation10 + $0x180] sm:$0xff]  ;;  %v157_v16 = vld [vmem:[#allocation10 + $0x190] sm:$0xff]  ;;  %v152_v17 = vld [vmem:[#allocation10 + $0x168] sm:$0xff]  ;;  %p2401_p13 = scmp.lt.s32.totalorder %s2399_s26, %s2395_s25 }
  0x46   :  { %197 = vmatprep.subr.mxu0 %v160_v9  ;;  %268 = vmatprep.subr.mxu1 %v162_v10  ;;  %v154_v18 = vld [vmem:[#allocation10 + $0x178] sm:$0xff]  ;;  %v151_v19 = vld [vmem:[#allocation10 + $0x160] sm:$0xff]  ;;  %v153_v20 = vld [vmem:[#allocation10 + $0x170] sm:$0xff] }
  0x47   :  { %198 = vmatpush1.msra.mxu0 %v159_v11  ;;  %269 = vmatpush1.msra.mxu1 %v161_v12  ;;  %v148_v21 = vld [vmem:[#allocation10 + $0x148] sm:$0xff]  ;;  %v150_v22 = vld [vmem:[#allocation10 + $0x158] sm:$0xff]  ;;  %v147_v23 = vld [vmem:[#allocation10 + $0x140] sm:$0xff]  ;;  %p2402_p0 = por %p2401_p13, %p2400_p12 }
  0x48   :  { %199 = vmatprep.subr.mxu0 %v156_v13  ;;  %270 = vmatprep.subr.mxu1 %v158_v14  ;;  %v149_v24 = vld [vmem:[#allocation10 + $0x150] sm:$0xff]  ;;  %v144_v25 = vld [vmem:[#allocation10 + $0x128] sm:$0xff]  ;;  %v146_v26 = vld [vmem:[#allocation10 + $0x138] sm:$0xff] }
  0x49   :  { %200 = vmatpush1.msra.mxu0 %v155_v15  ;;  %271 = vmatpush1.msra.mxu1 %v157_v16  ;;  %v143_v27 = vld [vmem:[#allocation10 + $0x120] sm:$0xff]  ;;  %v145_v28 = vld [vmem:[#allocation10 + $0x130] sm:$0xff]  ;;  %v140_v29 = vld [vmem:[#allocation10 + $0x108] sm:$0xff]  ;;  %p2403_p1 = pnand %p2402_p0, %p2396_p11 }
  0x4a   :  { %201 = vmatprep.subr.mxu0 %v152_v17  ;;  %272 = vmatprep.subr.mxu1 %v154_v18  ;;  %v142_v30 = vld [vmem:[#allocation10 + $0x118] sm:$0xff]  ;;  %v139_v31 = vld [vmem:[#allocation10 + $0x100] sm:$0xff]  ;;  %v141_v32 = vld [vmem:[#allocation10 + $0x110] sm:$0xff] }
  0x4b   :  { %202 = vmatpush1.msra.mxu0 %v151_v19  ;;  %273 = vmatpush1.msra.mxu1 %v153_v20  ;;  %v136_v33 = vld [vmem:[#allocation10 + $0xe8] sm:$0xff]  ;;  %v138_v34 = vld [vmem:[#allocation10 + $0xf8] sm:$0xff]  ;;  %v135_v35 = vld [vmem:[#allocation10 + $0xe0] sm:$0xff] }
  0x4c   :  { %203 = vmatprep.subr.mxu0 %v148_v21  ;;  %274 = vmatprep.subr.mxu1 %v150_v22  ;;  %v137_v36 = vld [vmem:[#allocation10 + $0xf0] sm:$0xff]  ;;  %v132_v37 = vld [vmem:[#allocation10 + $0xc8] sm:$0xff]  ;;  %v134_v38 = vld [vmem:[#allocation10 + $0xd8] sm:$0xff] }
  0x4d   :  { %204 = vmatpush1.msra.mxu0 %v147_v23  ;;  %275 = vmatpush1.msra.mxu1 %v149_v24  ;;  %v131_v39 = vld [vmem:[#allocation10 + $0xc0] sm:$0xff]  ;;  %v133_v40 = vld [vmem:[#allocation10 + $0xd0] sm:$0xff]  ;;  %v128_v41 = vld [vmem:[#allocation10 + $0xa8] sm:$0xff] }
  0x4e   :  { %205 = vmatprep.subr.mxu0 %v144_v25  ;;  %276 = vmatprep.subr.mxu1 %v146_v26  ;;  %v130_v42 = vld [vmem:[#allocation10 + $0xb8] sm:$0xff]  ;;  %v127_v43 = vld [vmem:[#allocation10 + $0xa0] sm:$0xff]  ;;  %v129_v44 = vld [vmem:[#allocation10 + $0xb0] sm:$0xff] }
  0x4f   :  { %206 = vmatpush1.msra.mxu0 %v143_v27  ;;  %277 = vmatpush1.msra.mxu1 %v145_v28  ;;  %v124_v45 = vld [vmem:[#allocation10 + $0x88] sm:$0xff]  ;;  %v126_v46 = vld [vmem:[#allocation10 + $0x98] sm:$0xff]  ;;  %v123_v47 = vld [vmem:[#allocation10 + $0x80] sm:$0xff] }
  0x50   :  { %207 = vmatprep.subr.mxu0 %v140_v29  ;;  %278 = vmatprep.subr.mxu1 %v142_v30  ;;  %v125_v48 = vld [vmem:[#allocation10 + $0x90] sm:$0xff]  ;;  %v120_v49 = vld [vmem:[#allocation10 + $0x68] sm:$0xff]  ;;  %v122_v50 = vld [vmem:[#allocation10 + $0x78] sm:$0xff] }
  0x51   :  { %208 = vmatpush1.msra.mxu0 %v139_v31  ;;  %279 = vmatpush1.msra.mxu1 %v141_v32  ;;  %v119_v51 = vld [vmem:[#allocation10 + $0x60] sm:$0xff]  ;;  %v121_v52 = vld [vmem:[#allocation10 + $0x70] sm:$0xff]  ;;  %v116_v53 = vld [vmem:[#allocation10 + $0x48] sm:$0xff] }
  0x52   :  { %209 = vmatprep.subr.mxu0 %v136_v33  ;;  %280 = vmatprep.subr.mxu1 %v138_v34  ;;  %v118_v54 = vld [vmem:[#allocation10 + $0x58] sm:$0xff]  ;;  %v115_v55 = vld [vmem:[#allocation10 + $0x40] sm:$0xff]  ;;  %v117_v56 = vld [vmem:[#allocation10 + $0x50] sm:$0xff] }
  0x53   :  { %210 = vmatpush1.msra.mxu0 %v135_v35  ;;  %281 = vmatpush1.msra.mxu1 %v137_v36  ;;  %v112_v57 = vld [vmem:[#allocation10 + $0x28] sm:$0xff]  ;;  %v114_v58 = vld [vmem:[#allocation10 + $0x38] sm:$0xff]  ;;  %v111_v59 = vld [vmem:[#allocation10 + $0x20] sm:$0xff] }
  0x54   :  { %211 = vmatprep.subr.mxu0 %v132_v37  ;;  %282 = vmatprep.subr.mxu1 %v134_v38  ;;  %v113_v60 = vld [vmem:[#allocation10 + $0x30] sm:$0xff]  ;;  %v108_v61 = vld [vmem:[#allocation10 + $0x8] sm:$0xff]  ;;  %v110_v62 = vld [vmem:[#allocation10 + $0x18] sm:$0xff] }
  0x55   :  { %212 = vmatpush1.msra.mxu0 %v131_v39  ;;  %283 = vmatpush1.msra.mxu1 %v133_v40  ;;  %v107_v63 = vld [vmem:[#allocation10] sm:$0xff]  ;;  %v109_v1 = vld [vmem:[#allocation10 + $0x10] sm:$0xff]  ;;  %v2554_v3 = vld [vmem:[#allocation11 + $0x1e8] sm:$0xff] }
  0x56   :  { %213 = vmatprep.subr.mxu0 %v128_v41  ;;  %284 = vmatprep.subr.mxu1 %v130_v42  ;;  %v106_v2 = vld [vmem:[%s3352_s0] sm:$0xff]  ;;  %3423 = vst [vmem:[#allocation23_spill] sm:$0xff] %v2554_v3  ;;  %v2558_v5 = vld [vmem:[#allocation11 + $0x1e0] sm:$0xff]  ;;  %v2563_v7 = vld [vmem:[#allocation11 + $0x1c8] sm:$0xff] }
  0x57   :  { %214 = vmatpush1.msra.mxu0 %v127_v43  ;;  %285 = vmatpush1.msra.mxu1 %v129_v44  ;;  %v2556_v4 = vld [vmem:[#allocation11 + $0x1f8] sm:$0xff]  ;;  %v2560_v6 = vld [vmem:[#allocation11 + $0x1f0] sm:$0xff]  ;;  %v2568_v9 = vld [vmem:[#allocation11 + $0x1c0] sm:$0xff] }
  0x58   :  { %215 = vmatprep.subr.mxu0 %v124_v45  ;;  %286 = vmatprep.subr.mxu1 %v126_v46  ;;  %3424 = vst [vmem:[#allocation24_spill] sm:$0xff] %v2556_v4  ;;  %v2565_v8 = vld [vmem:[#allocation11 + $0x1d8] sm:$0xff]  ;;  %v2570_v10 = vld [vmem:[#allocation11 + $0x1d0] sm:$0xff]  ;;  %v2574_v11 = vld [vmem:[#allocation11 + $0x1a8] sm:$0xff] }
  0x59   :  { %216 = vmatpush1.msra.mxu0 %v123_v47  ;;  %287 = vmatpush1.msra.mxu1 %v125_v48  ;;  %v2576_v12 = vld [vmem:[#allocation11 + $0x1b8] sm:$0xff]  ;;  %v2580_v13 = vld [vmem:[#allocation11 + $0x1a0] sm:$0xff]  ;;  %v2582_v14 = vld [vmem:[#allocation11 + $0x1b0] sm:$0xff] }
  0x5a   :  { %217 = vmatprep.subr.mxu0 %v120_v49  ;;  %288 = vmatprep.subr.mxu1 %v122_v50  ;;  %v2586_v15 = vld [vmem:[#allocation11 + $0x188] sm:$0xff]  ;;  %v2588_v16 = vld [vmem:[#allocation11 + $0x198] sm:$0xff]  ;;  %v2592_v17 = vld [vmem:[#allocation11 + $0x180] sm:$0xff] }
  0x5b   :  { %218 = vmatpush1.msra.mxu0 %v119_v51  ;;  %289 = vmatpush1.msra.mxu1 %v121_v52  ;;  %v2594_v18 = vld [vmem:[#allocation11 + $0x190] sm:$0xff]  ;;  %v2598_v19 = vld [vmem:[#allocation11 + $0x168] sm:$0xff]  ;;  %v2600_v20 = vld [vmem:[#allocation11 + $0x178] sm:$0xff] }
  0x5c   :  { %219 = vmatprep.subr.mxu0 %v116_v53  ;;  %290 = vmatprep.subr.mxu1 %v118_v54  ;;  %v2604_v21 = vld [vmem:[#allocation11 + $0x160] sm:$0xff]  ;;  %v2606_v22 = vld [vmem:[#allocation11 + $0x170] sm:$0xff]  ;;  %v2610_v23 = vld [vmem:[#allocation11 + $0x148] sm:$0xff] }
  0x5d   :  { %220 = vmatpush1.msra.mxu0 %v115_v55  ;;  %291 = vmatpush1.msra.mxu1 %v117_v56  ;;  %v2612_v24 = vld [vmem:[#allocation11 + $0x158] sm:$0xff]  ;;  %v2616_v25 = vld [vmem:[#allocation11 + $0x140] sm:$0xff]  ;;  %v2618_v26 = vld [vmem:[#allocation11 + $0x150] sm:$0xff] }
  0x5e   :  { %221 = vmatprep.subr.mxu0 %v112_v57  ;;  %292 = vmatprep.subr.mxu1 %v114_v58  ;;  %v2622_v27 = vld [vmem:[#allocation11 + $0x128] sm:$0xff]  ;;  %v2624_v28 = vld [vmem:[#allocation11 + $0x138] sm:$0xff]  ;;  %v2628_v30 = vld [vmem:[#allocation11 + $0x120] sm:$0xff] }
  0x5f   :  { %222 = vmatpush1.msra.mxu0 %v111_v59  ;;  %293 = vmatpush1.msra.mxu1 %v113_v60  ;;  %v102_v29 = vld [vmem:[#allocation5] sm:$0x1]  ;;  %v2630_v31 = vld [vmem:[#allocation11 + $0x130] sm:$0xff]  ;;  %v2634_v32 = vld [vmem:[#allocation11 + $0x108] sm:$0xff] }
  0x60   :  { %223 = vmatprep.subr.mxu0 %v108_v61  ;;  %294 = vmatprep.subr.mxu1 %v110_v62  ;;  %103 = vst [vmem:[#allocation2] sm:$0x1] %v102_v29  ;;  %v2636_v33 = vld [vmem:[#allocation11 + $0x118] sm:$0xff]  ;;  %v2640_v34 = vld [vmem:[#allocation11 + $0x100] sm:$0xff]  ;;  %v2642_v35 = vld [vmem:[#allocation11 + $0x110] sm:$0xff] }
  0x61   :  { %224 = vmatpush1.msra.mxu0 %v107_v63  ;;  %295 = vmatpush1.msra.mxu1 %v109_v1  ;;  %v2646_v36 = vld [vmem:[#allocation11 + $0xe8] sm:$0xff]  ;;  %v2648_v37 = vld [vmem:[#allocation11 + $0xf8] sm:$0xff]  ;;  %v2652_v38 = vld [vmem:[#allocation11 + $0xe0] sm:$0xff] }
  0x62   :  { %258 = vmatmul.mubr.f32.vlgmr.msra.gmra.mxu0 %v106_v2  ;;  %403 = vmatprep.subr.mxu0 %v2554_v3  ;;  %v2654_v39 = vld [vmem:[#allocation11 + $0xf0] sm:$0xff]  ;;  %v2658_v40 = vld [vmem:[#allocation11 + $0xc8] sm:$0xff]  ;;  %v2660_v41 = vld [vmem:[#allocation11 + $0xd8] sm:$0xff] }
  0x63   :  { %474 = vmatprep.subr.mxu1 %v2556_v4  ;;  %329 = vmatmul.mubr.f32.vlgmr.msra.gmra.mxu1 %v106_v2  ;;  %v2664_v42 = vld [vmem:[#allocation11 + $0xc0] sm:$0xff]  ;;  %v2666_v43 = vld [vmem:[#allocation11 + $0xd0] sm:$0xff]  ;;  %v2670_v44 = vld [vmem:[#allocation11 + $0xa8] sm:$0xff] }
  0x64   :  { %404 = vmatpush1.msra.mxu0 %v2558_v5  ;;  %475 = vmatpush1.msra.mxu1 %v2560_v6  ;;  %v2672_v45 = vld [vmem:[#allocation11 + $0xb8] sm:$0xff]  ;;  %v2676_v46 = vld [vmem:[#allocation11 + $0xa0] sm:$0xff]  ;;  %v2678_v47 = vld [vmem:[#allocation11 + $0xb0] sm:$0xff] }
  0x65   :  { %405 = vmatprep.subr.mxu0 %v2563_v7  ;;  %476 = vmatprep.subr.mxu1 %v2565_v8  ;;  %3425 = vst [vmem:[#allocation25_spill] sm:$0xff] %v2676_v46  ;;  %3426 = vst [vmem:[#allocation26_spill] sm:$0xff] %v2678_v47  ;;  %v2682_v48 = vld [vmem:[#allocation11 + $0x88] sm:$0xff]  ;;  %v2684_v49 = vld [vmem:[#allocation11 + $0x98] sm:$0xff] }
  0x66   :  { %406 = vmatpush1.msra.mxu0 %v2568_v9  ;;  %477 = vmatpush1.msra.mxu1 %v2570_v10  ;;  %3427 = vst [vmem:[#allocation27_spill] sm:$0xff] %v2682_v48  ;;  %3428 = vst [vmem:[#allocation28_spill] sm:$0xff] %v2684_v49  ;;  %v2688_v50 = vld [vmem:[#allocation11 + $0x80] sm:$0xff]  ;;  %v2690_v51 = vld [vmem:[#allocation11 + $0x90] sm:$0xff] }
  0x67   :  { %407 = vmatprep.subr.mxu0 %v2574_v11  ;;  %478 = vmatprep.subr.mxu1 %v2576_v12  ;;  %3429 = vst [vmem:[#allocation29_spill] sm:$0xff] %v2688_v50  ;;  %3430 = vst [vmem:[#allocation30_spill] sm:$0xff] %v2690_v51  ;;  %v2694_v52 = vld [vmem:[#allocation11 + $0x68] sm:$0xff]  ;;  %v2696_v53 = vld [vmem:[#allocation11 + $0x78] sm:$0xff] }
  0x68   :  { %408 = vmatpush1.msra.mxu0 %v2580_v13  ;;  %479 = vmatpush1.msra.mxu1 %v2582_v14  ;;  %3431 = vst [vmem:[#allocation31_spill] sm:$0xff] %v2694_v52  ;;  %3432 = vst [vmem:[#allocation32_spill] sm:$0xff] %v2696_v53  ;;  %v2700_v54 = vld [vmem:[#allocation11 + $0x60] sm:$0xff]  ;;  %v2702_v55 = vld [vmem:[#allocation11 + $0x70] sm:$0xff] }
  0x69   :  { %409 = vmatprep.subr.mxu0 %v2586_v15  ;;  %480 = vmatprep.subr.mxu1 %v2588_v16  ;;  %3433 = vst [vmem:[#allocation33_spill] sm:$0xff] %v2700_v54  ;;  %3434 = vst [vmem:[#allocation34_spill] sm:$0xff] %v2702_v55  ;;  %v2706_v56 = vld [vmem:[#allocation11 + $0x48] sm:$0xff]  ;;  %v2708_v57 = vld [vmem:[#allocation11 + $0x58] sm:$0xff] }
  0x6a   :  { %410 = vmatpush1.msra.mxu0 %v2592_v17  ;;  %481 = vmatpush1.msra.mxu1 %v2594_v18  ;;  %3435 = vst [vmem:[#allocation35_spill] sm:$0xff] %v2706_v56  ;;  %3436 = vst [vmem:[#allocation36_spill] sm:$0xff] %v2708_v57  ;;  %v2712_v58 = vld [vmem:[#allocation11 + $0x40] sm:$0xff]  ;;  %v2714_v59 = vld [vmem:[#allocation11 + $0x50] sm:$0xff] }
  0x6b   :  { %411 = vmatprep.subr.mxu0 %v2598_v19  ;;  %482 = vmatprep.subr.mxu1 %v2600_v20  ;;  %3437 = vst [vmem:[#allocation37_spill] sm:$0xff] %v2712_v58  ;;  %3438 = vst [vmem:[#allocation38_spill] sm:$0xff] %v2714_v59  ;;  %v2718_v60 = vld [vmem:[#allocation11 + $0x28] sm:$0xff]  ;;  %v2720_v61 = vld [vmem:[#allocation11 + $0x38] sm:$0xff] }
  0x6c   :  { %412 = vmatpush1.msra.mxu0 %v2604_v21  ;;  %483 = vmatpush1.msra.mxu1 %v2606_v22  ;;  %3439 = vst [vmem:[#allocation39_spill] sm:$0xff] %v2718_v60  ;;  %3440 = vst [vmem:[#allocation40_spill] sm:$0xff] %v2720_v61  ;;  %v2724_v62 = vld [vmem:[#allocation11 + $0x20] sm:$0xff]  ;;  %v2726_v63 = vld [vmem:[#allocation11 + $0x30] sm:$0xff] }
  0x6d   :  { %413 = vmatprep.subr.mxu0 %v2610_v23  ;;  %484 = vmatprep.subr.mxu1 %v2612_v24  ;;  %3441 = vst [vmem:[#allocation41_spill] sm:$0xff] %v2724_v62  ;;  %3442 = vst [vmem:[#allocation42_spill] sm:$0xff] %v2726_v63  ;;  %v2730_v1 = vld [vmem:[#allocation11 + $0x8] sm:$0xff]  ;;  %v2732_v2 = vld [vmem:[#allocation11 + $0x18] sm:$0xff] }
  0x6e   :  { %414 = vmatpush1.msra.mxu0 %v2616_v25  ;;  %485 = vmatpush1.msra.mxu1 %v2618_v26  ;;  %3443 = vst [vmem:[#allocation43_spill] sm:$0xff] %v2730_v1  ;;  %3444 = vst [vmem:[#allocation44_spill] sm:$0xff] %v2732_v2  ;;  %v2736_v29 = vld [vmem:[#allocation11] sm:$0xff]  ;;  %v2740_v0 = vld [vmem:[#allocation11 + $0x10] sm:$0xff] }
  0x6f   :  { %415 = vmatprep.subr.mxu0 %v2622_v27  ;;  %486 = vmatprep.subr.mxu1 %v2624_v28  ;;  %3445 = vst [vmem:[#allocation45_spill] sm:$0xff] %v2736_v29  ;;  %3446 = vst [vmem:[#allocation46_spill] sm:$0xff] %v2740_v0 }
  0x70   :  { %416 = vmatpush1.msra.mxu0 %v2628_v30  ;;  %487 = vmatpush1.msra.mxu1 %v2630_v31 }
  0x71   :  { %417 = vmatprep.subr.mxu0 %v2634_v32  ;;  %488 = vmatprep.subr.mxu1 %v2636_v33 }
  0x72   :  { %418 = vmatpush1.msra.mxu0 %v2640_v34  ;;  %489 = vmatpush1.msra.mxu1 %v2642_v35 }
  0x73   :  { %419 = vmatprep.subr.mxu0 %v2646_v36  ;;  %490 = vmatprep.subr.mxu1 %v2648_v37 }
  0x74   :  { %420 = vmatpush1.msra.mxu0 %v2652_v38  ;;  %491 = vmatpush1.msra.mxu1 %v2654_v39 }
  0x75   :  { %421 = vmatprep.subr.mxu0 %v2658_v40  ;;  %492 = vmatprep.subr.mxu1 %v2660_v41 }
  0x76   :  { %422 = vmatpush1.msra.mxu0 %v2664_v42  ;;  %493 = vmatpush1.msra.mxu1 %v2666_v43 }
  0x77   :  { %423 = vmatprep.subr.mxu0 %v2670_v44  ;;  %494 = vmatprep.subr.mxu1 %v2672_v45 }
  0x78   :  { %424 = vmatpush1.msra.mxu0 %v2676_v46  ;;  %495 = vmatpush1.msra.mxu1 %v2678_v47 }
  0x79   :  { %425 = vmatprep.subr.mxu0 %v2682_v48  ;;  %496 = vmatprep.subr.mxu1 %v2684_v49 }
  0x7a   :  { %426 = vmatpush1.msra.mxu0 %v2688_v50  ;;  %497 = vmatpush1.msra.mxu1 %v2690_v51 }
  0x7b   :  { %427 = vmatprep.subr.mxu0 %v2694_v52  ;;  %498 = vmatprep.subr.mxu1 %v2696_v53 }
  0x7c   :  { %428 = vmatpush1.msra.mxu0 %v2700_v54  ;;  %499 = vmatpush1.msra.mxu1 %v2702_v55 }
  0x7d   :  { %429 = vmatprep.subr.mxu0 %v2706_v56  ;;  %500 = vmatprep.subr.mxu1 %v2708_v57 }
  0x7e   :  { %430 = vmatpush1.msra.mxu0 %v2712_v58  ;;  %501 = vmatpush1.msra.mxu1 %v2714_v59  ;;  %v399_v59 = vld [vmem:[#allocation2] sm:$0x1]  ;;  %v3447_v58 = vmov 0.0  }
  0x7f   :  { %431 = vmatprep.subr.mxu0 %v2718_v60  ;;  %502 = vmatprep.subr.mxu1 %v2720_v61 }
  0x80   :  { %432 = vmatpush1.msra.mxu0 %v2724_v62  ;;  %503 = vmatpush1.msra.mxu1 %v2726_v63 }
  0x81   :  { %433 = vmatprep.subr.mxu0 %v2730_v1  ;;  %504 = vmatprep.subr.mxu1 %v2732_v2 }
  0x82   :  { %434 = vmatpush1.msra.mxu0 %v2736_v29  ;;  %467 = vmatprep.mubr.f32.mxu0 %v3447_v58 }
  0x83   :  { %505 = vmatpush1.msra.mxu1 %v2740_v0  ;;  %538 = vmatprep.mubr.f32.mxu1 %v3447_v58 }
  0x84   :  { %468 = vmatmul.mubr.f32.vlgmr.msra.gmra.mxu0 %v399_v59  ;;  %539 = vmatmul.mubr.f32.vlgmr.msra.gmra.mxu1 %v399_v59  ;;  %v3448_v59 = vld [vmem:[#allocation37_spill] sm:$0xff] }
  0x85   :  { %581 = vmatprep.subr.mxu0 %v2554_v3  ;;  %652 = vmatprep.subr.mxu1 %v2556_v4 }
  0x86   :  { %582 = vmatpush1.msra.mxu0 %v2558_v5  ;;  %653 = vmatpush1.msra.mxu1 %v2560_v6 }
  0x87   :  { %583 = vmatprep.subr.mxu0 %v2563_v7  ;;  %654 = vmatprep.subr.mxu1 %v2565_v8 }
  0x88   :  { %584 = vmatpush1.msra.mxu0 %v2568_v9  ;;  %655 = vmatpush1.msra.mxu1 %v2570_v10 }
  0x89   :  { %585 = vmatprep.subr.mxu0 %v2574_v11  ;;  %656 = vmatprep.subr.mxu1 %v2576_v12 }
  0x8a   :  { %586 = vmatpush1.msra.mxu0 %v2580_v13  ;;  %657 = vmatpush1.msra.mxu1 %v2582_v14 }
  0x8b   :  { %587 = vmatprep.subr.mxu0 %v2586_v15  ;;  %658 = vmatprep.subr.mxu1 %v2588_v16 }
  0x8c   :  { %588 = vmatpush1.msra.mxu0 %v2592_v17  ;;  %659 = vmatpush1.msra.mxu1 %v2594_v18 }
  0x8d   :  { %589 = vmatprep.subr.mxu0 %v2598_v19  ;;  %660 = vmatprep.subr.mxu1 %v2600_v20 }
  0x8e   :  { %590 = vmatpush1.msra.mxu0 %v2604_v21  ;;  %661 = vmatpush1.msra.mxu1 %v2606_v22 }
  0x8f   :  { %591 = vmatprep.subr.mxu0 %v2610_v23  ;;  %662 = vmatprep.subr.mxu1 %v2612_v24 }
  0x90   :  { %592 = vmatpush1.msra.mxu0 %v2616_v25  ;;  %663 = vmatpush1.msra.mxu1 %v2618_v26 }
  0x91   :  { %593 = vmatprep.subr.mxu0 %v2622_v27  ;;  %664 = vmatprep.subr.mxu1 %v2624_v28 }
  0x92   :  { %594 = vmatpush1.msra.mxu0 %v2628_v30  ;;  %665 = vmatpush1.msra.mxu1 %v2630_v31 }
  0x93   :  { %595 = vmatprep.subr.mxu0 %v2634_v32  ;;  %666 = vmatprep.subr.mxu1 %v2636_v33 }
  0x94   :  { %596 = vmatpush1.msra.mxu0 %v2640_v34  ;;  %667 = vmatpush1.msra.mxu1 %v2642_v35 }
  0x95   :  { %597 = vmatprep.subr.mxu0 %v2646_v36  ;;  %668 = vmatprep.subr.mxu1 %v2648_v37 }
  0x96   :  { %598 = vmatpush1.msra.mxu0 %v2652_v38  ;;  %669 = vmatpush1.msra.mxu1 %v2654_v39 }
  0x97   :  { %599 = vmatprep.subr.mxu0 %v2658_v40  ;;  %670 = vmatprep.subr.mxu1 %v2660_v41 }
  0x98   :  { %600 = vmatpush1.msra.mxu0 %v2664_v42  ;;  %671 = vmatpush1.msra.mxu1 %v2666_v43 }
  0x99   :  { %601 = vmatprep.subr.mxu0 %v2670_v44  ;;  %672 = vmatprep.subr.mxu1 %v2672_v45 }
  0x9a   :  { %602 = vmatpush1.msra.mxu0 %v2676_v46  ;;  %673 = vmatpush1.msra.mxu1 %v2678_v47 }
  0x9b   :  { %603 = vmatprep.subr.mxu0 %v2682_v48  ;;  %674 = vmatprep.subr.mxu1 %v2684_v49  ;;  %v3449_v48 = vld [vmem:[#allocation38_spill] sm:$0xff] }
  0x9c   :  { %604 = vmatpush1.msra.mxu0 %v2688_v50  ;;  %675 = vmatpush1.msra.mxu1 %v2690_v51 }
  0x9d   :  { %605 = vmatprep.subr.mxu0 %v2694_v52  ;;  %676 = vmatprep.subr.mxu1 %v2696_v53 }
  0x9e   :  { %606 = vmatpush1.msra.mxu0 %v2700_v54  ;;  %677 = vmatpush1.msra.mxu1 %v2702_v55 }
  0x9f   :  { %607 = vmatprep.subr.mxu0 %v2706_v56  ;;  %678 = vmatprep.subr.mxu1 %v2708_v57 }
  0xa0   :  { %608 = vmatpush1.msra.mxu0 %v3448_v59  ;;  %679 = vmatpush1.msra.mxu1 %v3449_v48 }
  0xa1   :  { %609 = vmatprep.subr.mxu0 %v2718_v60  ;;  %680 = vmatprep.subr.mxu1 %v2720_v61  ;;  %v104_v61 = vld [vmem:[#allocation8] sm:$0x1] }
  0xa2   :  { %610 = vmatpush1.msra.mxu0 %v2724_v62  ;;  %681 = vmatpush1.msra.mxu1 %v2726_v63  ;;  %105 = vst [vmem:[#allocation3] sm:$0x1] %v104_v61  ;;  %v173_v62 = vlaneseq }
  0xa3   :  { %611 = vmatprep.subr.mxu0 %v2730_v1  ;;  %682 = vmatprep.subr.mxu1 %v2732_v2  ;;  %v171_v2 = vld [vmem:[%s3357_s5] sm:$0xf] }
  0xa4   :  { %612 = vmatpush1.msra.mxu0 %v2736_v29  ;;  %683 = vmatpush1.msra.mxu1 %v2740_v0  ;;  %v174_v63 = vshrl.u32 %v173_v62, 7 }
  0xa5   :  { %645 = vmatprep.mubr.f32.mxu0 %v3447_v58  ;;  %716 = vmatprep.mubr.f32.mxu1 %v3447_v58 }
  0xa6   :  { %780 = vmatprep.subr.mxu0 %v2554_v3  ;;  %851 = vmatprep.subr.mxu1 %v2556_v4  ;;  %v175_v60 = vsub.s32 0, %v174_v63  ;;  %v179_v29 = vsub.s32 1, %v174_v63  ;;  %v183_v55 = vsub.s32 2, %v174_v63  ;;  %v187_v50 = vsub.s32 3, %v174_v63 }
  0xa8   :  { %v176_v0 = vrot.slane %v171_v2, %v175_v60  ;;  %v180_v48 = vrot.slane %v171_v2, %v179_v29  ;;  %v184_v52 = vrot.slane %v171_v2, %v183_v55  ;;  %v188_v60 = vrot.slane %v171_v2, %v187_v50 }
  0xa9   :  { %v400_v55 = vld [vmem:[#allocation3] sm:$0x1] }
 0x122   :  { %v259_v1 = vpop.f32.mrf.mxu0 }
 0x123   :  { %v260_v57 = vadd.f32 %v259_v1, %v176_v0  ;;  %v330_v54 = vpop.f32.mrf.mxu1 }
 0x124   :  { %v261_v59 = vpop.f32.mrf.mxu0  ;;  %v331_v47 = vadd.f32 %v330_v54, %v184_v52 }
 0x125   :  { %v262_v56 = vadd.f32 %v261_v59, %v180_v48  ;;  %v332_v51 = vpop.f32.mrf.mxu1 }
 0x126   :  { %v333_v0 = vadd.f32 %v332_v51, %v188_v60 }
 0x144   :  { %v469_v58 = vpop.f32.mrf.mxu0  ;;  %v540_v49 = vpop.f32.mrf.mxu1 }
 0x145   :  { %v545_v3 = vadd.f32 %v469_v58, %v260_v57  ;;  %v547_v29 = vadd.f32 %v540_v49, %v331_v47 }
 0x146   :  { %v471_v4 = vpop.f32.mrf.mxu0  ;;  %v542_v46 = vpop.f32.mrf.mxu1 }
 0x147   :  { %v2115_v61 = vmul.f32 -1.442695, %v545_v3  ;;  %v546_v53 = vadd.f32 %v471_v4, %v262_v56  ;;  %v2117_v1 = vmul.f32 -1.442695, %v547_v29  ;;  %v548_v57 = vadd.f32 %v542_v46, %v333_v0 }
 0x149   :  { %2211 = vpow2.f32 %v2115_v61  ;;  %v2116_v62 = vmul.f32 -1.442695, %v546_v53 }
 0x14b   :  { %2213 = vpow2.f32 %v2116_v62 }
 0x14c   :  { %2215 = vpow2.f32 %v2117_v1 }
 0x156   :  { %v2212_v48 = vpop.eup %2211 }
 0x157   :  { %v558_v58 = vadd.f32 1.0, %v2212_v48 }
 0x158   :  { %v2214_v59 = vpop.eup %2213 }
 0x159   :  { %2217 = vrcp.f32 %v558_v58  ;;  %v559_v3 = vadd.f32 1.0, %v2214_v59  ;;  %v2216_v4 = vpop.eup %2215  ;;  %v3455_v58 = vld [vmem:[#allocation25_spill] sm:$0xff]  ;;  %v3456_v59 = vld [vmem:[#allocation26_spill] sm:$0xff] }
 0x15a   :  { %2219 = vtanh.f32 %v548_v57  ;;  %v560_v52 = vadd.f32 1.0, %v2216_v4  ;;  %v3458_v4 = vld [vmem:[#allocation28_spill] sm:$0xff] }
 0x15b   :  { %2221 = vrcp.f32 %v559_v3  ;;  %v3457_v3 = vld [vmem:[#allocation27_spill] sm:$0xff] }
 0x15c   :  { %2223 = vrcp.f32 %v560_v52  ;;  %v3463_v52 = vld [vmem:[#allocation33_spill] sm:$0xff] }
 0x166   :  { %v2218_v53 = vpop.eup %2217 }
 0x167   :  { %v2220_v56 = vpop.eup %2219 }
 0x168   :  { %v2222_v63 = vpop.eup %2221  ;;  %v569_v47 = vmul.f32 %v2220_v56, %v2218_v53  ;;  %v3459_v53 = vld [vmem:[#allocation29_spill] sm:$0xff]  ;;  %v3461_v56 = vld [vmem:[#allocation31_spill] sm:$0xff] }
 0x169   :  { %v568_v50 = vmul.f32 %v2222_v63, %v400_v55  ;;  %v2224_v54 = vpop.eup %2223  ;;  %v3460_v55 = vld [vmem:[#allocation30_spill] sm:$0xff]  ;;  %v3462_v63 = vld [vmem:[#allocation32_spill] sm:$0xff] }
 0x16b   :  { %v570_v49 = vadd.f32 %v569_v47, %v568_v50  ;;  %v3464_v50 = vld [vmem:[#allocation34_spill] sm:$0xff]  ;;  %v3465_v47 = vld [vmem:[#allocation35_spill] sm:$0xff] }
 0x16d   :  { %2225 = vtanh.f32 %v570_v49  ;;  %v2144_v51 = vrot.slane %v570_v49, 42  ;;  %v3466_v49 = vld [vmem:[#allocation36_spill] sm:$0xff] }
 0x16f   :  { %v1948_v46 = vrot.slane %v2144_v51, 7  ;;  %v3467_v51 = vld [vmem:[#allocation37_spill] sm:$0xff] }
 0x171   :  { %1964 = vst [vmem:[#allocation3 - $0x7] sm:$0x80] %v1948_v46  ;;  %2070 = vst [vmem:[#allocation17 - $0x7] sm:$0x80] %v1948_v46  ;;  %v3468_v46 = vld [vmem:[#allocation38_spill] sm:$0xff] }
 0x17a   :  { %v2226_v2 = vpop.eup %2225 }
 0x17b   :  { %v572_v61 = vmul.f32 %v2226_v2, %v2224_v54  ;;  %v3469_v54 = vld [vmem:[#allocation39_spill] sm:$0xff]  ;;  %v3470_v2 = vld [vmem:[#allocation40_spill] sm:$0xff] }
 0x17d   :  { %578 = vst [vmem:[#allocation4] sm:$0x1] %v572_v61  ;;  %646 = vmatmul.mubr.f32.vlgmr.msra.gmra.mxu0 %v572_v61  ;;  %717 = vmatmul.mubr.f32.vlgmr.msra.gmra.mxu1 %v572_v61  ;;  %v2819_v62 = vrot.slane %v572_v61, 7  ;;  %v3471_v61 = vld [vmem:[#allocation41_spill] sm:$0xff] }
 0x17e   :  { %781 = vmatpush1.msra.mxu0 %v2558_v5  ;;  %852 = vmatpush1.msra.mxu1 %v2560_v6 }
 0x17f   :  { %782 = vmatprep.subr.mxu0 %v2563_v7  ;;  %853 = vmatprep.subr.mxu1 %v2565_v8  ;;  %774 = vst [vmem:[#allocation4] sm:$0x2] %v2819_v62  ;;  %v2827_v60 = vrot.slane %v2819_v62, 7 }
 0x180   :  { %783 = vmatpush1.msra.mxu0 %v2568_v9  ;;  %854 = vmatpush1.msra.mxu1 %v2570_v10 }
 0x181   :  { %3450 = vst [vmem:[#allocation47_spill] sm:$0xff] %v2827_v60  ;;  %784 = vmatprep.subr.mxu0 %v2574_v11  ;;  %855 = vmatprep.subr.mxu1 %v2576_v12  ;;  %972 = vst [vmem:[#allocation4] sm:$0x4] %v2827_v60  ;;  %v2835_v29 = vrot.slane %v2827_v60, 7  ;;  %v778_v60 = vrot.slane %v2819_v62, 1  ;;  %v3480_v62 = vld [vmem:[#allocation37_spill] sm:$0xff] }
 0x182   :  { %785 = vmatpush1.msra.mxu0 %v2580_v13  ;;  %856 = vmatpush1.msra.mxu1 %v2582_v14 }
 0x183   :  { %3451 = vst [vmem:[#allocation48_spill] sm:$0xff] %v2835_v29  ;;  %786 = vmatprep.subr.mxu0 %v2586_v15  ;;  %857 = vmatprep.subr.mxu1 %v2588_v16  ;;  %1170 = vst [vmem:[#allocation4] sm:$0x8] %v2835_v29  ;;  %v2843_v0 = vrot.slane %v2835_v29, 7  ;;  %v3476_v29 = vmov 0.0  }
 0x184   :  { %787 = vmatpush1.msra.mxu0 %v2592_v17  ;;  %858 = vmatpush1.msra.mxu1 %v2594_v18 }
 0x185   :  { %3452 = vst [vmem:[#allocation49_spill] sm:$0xff] %v2843_v0  ;;  %788 = vmatprep.subr.mxu0 %v2598_v19  ;;  %859 = vmatprep.subr.mxu1 %v2600_v20  ;;  %1368 = vst [vmem:[#allocation4] sm:$0x10] %v2843_v0  ;;  %v2851_v1 = vrot.slane %v2843_v0, 7  ;;  %v3475_v0 = vld [vmem:[#allocation45_spill] sm:$0xff] }
 0x186   :  { %789 = vmatpush1.msra.mxu0 %v2604_v21  ;;  %860 = vmatpush1.msra.mxu1 %v2606_v22 }
 0x187   :  { %3453 = vst [vmem:[#allocation50_spill] sm:$0xff] %v2851_v1  ;;  %790 = vmatprep.subr.mxu0 %v2610_v23  ;;  %861 = vmatprep.subr.mxu1 %v2612_v24  ;;  %1566 = vst [vmem:[#allocation4] sm:$0x20] %v2851_v1  ;;  %v2859_v48 = vrot.slane %v2851_v1, 7  ;;  %v3474_v1 = vld [vmem:[#allocation44_spill] sm:$0xff] }
 0x188   :  { %791 = vmatpush1.msra.mxu0 %v2616_v25  ;;  %862 = vmatpush1.msra.mxu1 %v2618_v26 }
 0x189   :  { %3454 = vst [vmem:[#allocation51_spill] sm:$0xff] %v2859_v48  ;;  %792 = vmatprep.subr.mxu0 %v2622_v27  ;;  %863 = vmatprep.subr.mxu1 %v2624_v28  ;;  %1764 = vst [vmem:[#allocation4] sm:$0x40] %v2859_v48  ;;  %v1958_v57 = vrot.slane %v2859_v48, 7  ;;  %v3473_v48 = vld [vmem:[#allocation43_spill] sm:$0xff] }
 0x18a   :  { %793 = vmatpush1.msra.mxu0 %v2628_v30  ;;  %864 = vmatpush1.msra.mxu1 %v2630_v31 }
 0x18b   :  { %794 = vmatprep.subr.mxu0 %v2634_v32  ;;  %865 = vmatprep.subr.mxu1 %v2636_v33  ;;  %1962 = vst [vmem:[#allocation4] sm:$0x80] %v1958_v57  ;;  %1963 = vst [vmem:[#allocation2 - $0x7] sm:$0x80] %v1958_v57 }
 0x18c   :  { %2069 = vst [vmem:[#allocation15 - $0x7] sm:$0x80] %v1958_v57  ;;  %795 = vmatpush1.msra.mxu0 %v2640_v34  ;;  %866 = vmatpush1.msra.mxu1 %v2642_v35  ;;  %v3472_v57 = vld [vmem:[#allocation42_spill] sm:$0xff] }
 0x18d   :  { %796 = vmatprep.subr.mxu0 %v2646_v36  ;;  %867 = vmatprep.subr.mxu1 %v2648_v37 }
 0x18e   :  { %797 = vmatpush1.msra.mxu0 %v2652_v38  ;;  %868 = vmatpush1.msra.mxu1 %v2654_v39 }
 0x18f   :  { %798 = vmatprep.subr.mxu0 %v2658_v40  ;;  %869 = vmatprep.subr.mxu1 %v2660_v41 }
 0x190   :  { %799 = vmatpush1.msra.mxu0 %v2664_v42  ;;  %870 = vmatpush1.msra.mxu1 %v2666_v43 }
 0x191   :  { %800 = vmatprep.subr.mxu0 %v2670_v44  ;;  %871 = vmatprep.subr.mxu1 %v2672_v45 }
 0x192   :  { %801 = vmatpush1.msra.mxu0 %v3455_v58  ;;  %872 = vmatpush1.msra.mxu1 %v3456_v59 }
 0x193   :  { %802 = vmatprep.subr.mxu0 %v3457_v3  ;;  %873 = vmatprep.subr.mxu1 %v3458_v4 }
 0x194   :  { %803 = vmatpush1.msra.mxu0 %v3459_v53  ;;  %874 = vmatpush1.msra.mxu1 %v3460_v55 }
 0x195   :  { %804 = vmatprep.subr.mxu0 %v3461_v56  ;;  %875 = vmatprep.subr.mxu1 %v3462_v63 }
 0x196   :  { %805 = vmatpush1.msra.mxu0 %v3463_v52  ;;  %876 = vmatpush1.msra.mxu1 %v3464_v50 }
 0x197   :  { %806 = vmatprep.subr.mxu0 %v3465_v47  ;;  %877 = vmatprep.subr.mxu1 %v3466_v49 }
 0x198   :  { %807 = vmatpush1.msra.mxu0 %v3467_v51  ;;  %878 = vmatpush1.msra.mxu1 %v3468_v46  ;;  %v3477_v51 = vld [vmem:[#allocation46_spill] sm:$0xff] }
 0x199   :  { %808 = vmatprep.subr.mxu0 %v3469_v54  ;;  %879 = vmatprep.subr.mxu1 %v3470_v2  ;;  %v3478_v2 = vld [vmem:[#allocation23_spill] sm:$0xff] }
 0x19a   :  { %809 = vmatpush1.msra.mxu0 %v3471_v61  ;;  %880 = vmatpush1.msra.mxu1 %v3472_v57  ;;  %v3479_v61 = vld [vmem:[#allocation24_spill] sm:$0xff] }
 0x19b   :  { %810 = vmatprep.subr.mxu0 %v3473_v48  ;;  %881 = vmatprep.subr.mxu1 %v3474_v1 }
 0x19c   :  { %811 = vmatpush1.msra.mxu0 %v3475_v0  ;;  %844 = vmatprep.mubr.f32.mxu0 %v3476_v29 }
 0x19d   :  { %882 = vmatpush1.msra.mxu1 %v3477_v51  ;;  %915 = vmatprep.mubr.f32.mxu1 %v3476_v29 }
 0x19e   :  { %845 = vmatmul.mubr.f32.vlgmr.msra.gmra.mxu0 %v778_v60  ;;  %916 = vmatmul.mubr.f32.vlgmr.msra.gmra.mxu1 %v778_v60  ;;  %v3481_v60 = vld [vmem:[#allocation40_spill] sm:$0xff] }
 0x19f   :  { %978 = vmatprep.subr.mxu0 %v3478_v2  ;;  %1049 = vmatprep.subr.mxu1 %v3479_v61 }
 0x1a0   :  { %979 = vmatpush1.msra.mxu0 %v2558_v5  ;;  %1050 = vmatpush1.msra.mxu1 %v2560_v6 }
 0x1a1   :  { %980 = vmatprep.subr.mxu0 %v2563_v7  ;;  %1051 = vmatprep.subr.mxu1 %v2565_v8 }
 0x1a2   :  { %981 = vmatpush1.msra.mxu0 %v2568_v9  ;;  %1052 = vmatpush1.msra.mxu1 %v2570_v10 }
 0x1a3   :  { %982 = vmatprep.subr.mxu0 %v2574_v11  ;;  %1053 = vmatprep.subr.mxu1 %v2576_v12 }
 0x1a4   :  { %983 = vmatpush1.msra.mxu0 %v2580_v13  ;;  %1054 = vmatpush1.msra.mxu1 %v2582_v14 }
 0x1a5   :  { %984 = vmatprep.subr.mxu0 %v2586_v15  ;;  %1055 = vmatprep.subr.mxu1 %v2588_v16 }
 0x1a6   :  { %985 = vmatpush1.msra.mxu0 %v2592_v17  ;;  %1056 = vmatpush1.msra.mxu1 %v2594_v18 }
 0x1a7   :  { %986 = vmatprep.subr.mxu0 %v2598_v19  ;;  %1057 = vmatprep.subr.mxu1 %v2600_v20 }
 0x1a8   :  { %987 = vmatpush1.msra.mxu0 %v2604_v21  ;;  %1058 = vmatpush1.msra.mxu1 %v2606_v22 }
 0x1a9   :  { %988 = vmatprep.subr.mxu0 %v2610_v23  ;;  %1059 = vmatprep.subr.mxu1 %v2612_v24 }
 0x1aa   :  { %989 = vmatpush1.msra.mxu0 %v2616_v25  ;;  %1060 = vmatpush1.msra.mxu1 %v2618_v26 }
 0x1ab   :  { %990 = vmatprep.subr.mxu0 %v2622_v27  ;;  %1061 = vmatprep.subr.mxu1 %v2624_v28 }
 0x1ac   :  { %991 = vmatpush1.msra.mxu0 %v2628_v30  ;;  %1062 = vmatpush1.msra.mxu1 %v2630_v31 }
 0x1ad   :  { %992 = vmatprep.subr.mxu0 %v2634_v32  ;;  %1063 = vmatprep.subr.mxu1 %v2636_v33 }
 0x1ae   :  { %993 = vmatpush1.msra.mxu0 %v2640_v34  ;;  %1064 = vmatpush1.msra.mxu1 %v2642_v35 }
 0x1af   :  { %994 = vmatprep.subr.mxu0 %v2646_v36  ;;  %1065 = vmatprep.subr.mxu1 %v2648_v37 }
 0x1b0   :  { %995 = vmatpush1.msra.mxu0 %v2652_v38  ;;  %1066 = vmatpush1.msra.mxu1 %v2654_v39 }
 0x1b1   :  { %996 = vmatprep.subr.mxu0 %v2658_v40  ;;  %1067 = vmatprep.subr.mxu1 %v2660_v41 }
 0x1b2   :  { %997 = vmatpush1.msra.mxu0 %v2664_v42  ;;  %1068 = vmatpush1.msra.mxu1 %v2666_v43 }
 0x1b3   :  { %998 = vmatprep.subr.mxu0 %v2670_v44  ;;  %1069 = vmatprep.subr.mxu1 %v2672_v45 }
 0x1b4   :  { %999 = vmatpush1.msra.mxu0 %v3455_v58  ;;  %1070 = vmatpush1.msra.mxu1 %v3456_v59 }
 0x1b5   :  { %1000 = vmatprep.subr.mxu0 %v3457_v3  ;;  %1071 = vmatprep.subr.mxu1 %v3458_v4 }
 0x1b6   :  { %1001 = vmatpush1.msra.mxu0 %v3459_v53  ;;  %1072 = vmatpush1.msra.mxu1 %v3460_v55  ;;  %v3482_v55 = vld [vmem:[#allocation41_spill] sm:$0xff] }
 0x1b7   :  { %1002 = vmatprep.subr.mxu0 %v3461_v56  ;;  %1073 = vmatprep.subr.mxu1 %v3462_v63 }
 0x1b8   :  { %1003 = vmatpush1.msra.mxu0 %v3463_v52  ;;  %1074 = vmatpush1.msra.mxu1 %v3464_v50 }
 0x1b9   :  { %1004 = vmatprep.subr.mxu0 %v3465_v47  ;;  %1075 = vmatprep.subr.mxu1 %v3466_v49  ;;  %v3483_v49 = vld [vmem:[#allocation47_spill] sm:$0xff] }
 0x1ba   :  { %1005 = vmatpush1.msra.mxu0 %v3480_v62  ;;  %1076 = vmatpush1.msra.mxu1 %v3468_v46  ;;  %v976_v62 = vrot.slane %v3483_v49, 2  ;;  %v3484_v49 = vld [vmem:[#allocation30_spill] sm:$0xff] }
 0x1bb   :  { %1006 = vmatprep.subr.mxu0 %v3469_v54  ;;  %1077 = vmatprep.subr.mxu1 %v3481_v60 }
 0x1bc   :  { %1007 = vmatpush1.msra.mxu0 %v3482_v55  ;;  %1078 = vmatpush1.msra.mxu1 %v3472_v57 }
 0x1bd   :  { %1008 = vmatprep.subr.mxu0 %v3473_v48  ;;  %1079 = vmatprep.subr.mxu1 %v3474_v1 }
 0x1be   :  { %1009 = vmatpush1.msra.mxu0 %v3475_v0  ;;  %1042 = vmatprep.mubr.f32.mxu0 %v3476_v29 }
 0x1bf   :  { %1080 = vmatpush1.msra.mxu1 %v3477_v51  ;;  %1113 = vmatprep.mubr.f32.mxu1 %v3476_v29 }
 0x1c0   :  { %1043 = vmatmul.mubr.f32.vlgmr.msra.gmra.mxu0 %v976_v62  ;;  %1114 = vmatmul.mubr.f32.vlgmr.msra.gmra.mxu1 %v976_v62  ;;  %v3485_v62 = vld [vmem:[#allocation36_spill] sm:$0xff] }
 0x1c1   :  { %1176 = vmatprep.subr.mxu0 %v3478_v2  ;;  %1247 = vmatprep.subr.mxu1 %v3479_v61 }
 0x1c2   :  { %1177 = vmatpush1.msra.mxu0 %v2558_v5  ;;  %1248 = vmatpush1.msra.mxu1 %v2560_v6 }
 0x1c3   :  { %1178 = vmatprep.subr.mxu0 %v2563_v7  ;;  %1249 = vmatprep.subr.mxu1 %v2565_v8 }
 0x1c4   :  { %1179 = vmatpush1.msra.mxu0 %v2568_v9  ;;  %1250 = vmatpush1.msra.mxu1 %v2570_v10 }
 0x1c5   :  { %1180 = vmatprep.subr.mxu0 %v2574_v11  ;;  %1251 = vmatprep.subr.mxu1 %v2576_v12 }
 0x1c6   :  { %1181 = vmatpush1.msra.mxu0 %v2580_v13  ;;  %1252 = vmatpush1.msra.mxu1 %v2582_v14 }
 0x1c7   :  { %1182 = vmatprep.subr.mxu0 %v2586_v15  ;;  %1253 = vmatprep.subr.mxu1 %v2588_v16 }
 0x1c8   :  { %1183 = vmatpush1.msra.mxu0 %v2592_v17  ;;  %1254 = vmatpush1.msra.mxu1 %v2594_v18 }
 0x1c9   :  { %1184 = vmatprep.subr.mxu0 %v2598_v19  ;;  %1255 = vmatprep.subr.mxu1 %v2600_v20 }
 0x1ca   :  { %1185 = vmatpush1.msra.mxu0 %v2604_v21  ;;  %1256 = vmatpush1.msra.mxu1 %v2606_v22 }
 0x1cb   :  { %1186 = vmatprep.subr.mxu0 %v2610_v23  ;;  %1257 = vmatprep.subr.mxu1 %v2612_v24 }
 0x1cc   :  { %1187 = vmatpush1.msra.mxu0 %v2616_v25  ;;  %1258 = vmatpush1.msra.mxu1 %v2618_v26 }
 0x1cd   :  { %1188 = vmatprep.subr.mxu0 %v2622_v27  ;;  %1259 = vmatprep.subr.mxu1 %v2624_v28 }
 0x1ce   :  { %1189 = vmatpush1.msra.mxu0 %v2628_v30  ;;  %1260 = vmatpush1.msra.mxu1 %v2630_v31 }
 0x1cf   :  { %1190 = vmatprep.subr.mxu0 %v2634_v32  ;;  %1261 = vmatprep.subr.mxu1 %v2636_v33 }
 0x1d0   :  { %1191 = vmatpush1.msra.mxu0 %v2640_v34  ;;  %1262 = vmatpush1.msra.mxu1 %v2642_v35 }
 0x1d1   :  { %1192 = vmatprep.subr.mxu0 %v2646_v36  ;;  %1263 = vmatprep.subr.mxu1 %v2648_v37 }
 0x1d2   :  { %1193 = vmatpush1.msra.mxu0 %v2652_v38  ;;  %1264 = vmatpush1.msra.mxu1 %v2654_v39 }
 0x1d3   :  { %1194 = vmatprep.subr.mxu0 %v2658_v40  ;;  %1265 = vmatprep.subr.mxu1 %v2660_v41 }
 0x1d4   :  { %1195 = vmatpush1.msra.mxu0 %v2664_v42  ;;  %1266 = vmatpush1.msra.mxu1 %v2666_v43 }
 0x1d5   :  { %1196 = vmatprep.subr.mxu0 %v2670_v44  ;;  %1267 = vmatprep.subr.mxu1 %v2672_v45 }
 0x1d6   :  { %1197 = vmatpush1.msra.mxu0 %v3455_v58  ;;  %1268 = vmatpush1.msra.mxu1 %v3456_v59  ;;  %v3486_v59 = vld [vmem:[#allocation37_spill] sm:$0xff] }
 0x1d7   :  { %1198 = vmatprep.subr.mxu0 %v3457_v3  ;;  %1269 = vmatprep.subr.mxu1 %v3458_v4 }
 0x1d8   :  { %1199 = vmatpush1.msra.mxu0 %v3459_v53  ;;  %1270 = vmatpush1.msra.mxu1 %v3484_v49 }
 0x1d9   :  { %1200 = vmatprep.subr.mxu0 %v3461_v56  ;;  %1271 = vmatprep.subr.mxu1 %v3462_v63 }
 0x1da   :  { %1201 = vmatpush1.msra.mxu0 %v3463_v52  ;;  %1272 = vmatpush1.msra.mxu1 %v3464_v50 }
 0x1db   :  { %1202 = vmatprep.subr.mxu0 %v3465_v47  ;;  %1273 = vmatprep.subr.mxu1 %v3485_v62  ;;  %v3487_v62 = vld [vmem:[#allocation48_spill] sm:$0xff] }
 0x1dc   :  { %1203 = vmatpush1.msra.mxu0 %v3486_v59  ;;  %1274 = vmatpush1.msra.mxu1 %v3468_v46  ;;  %v1174_v59 = vrot.slane %v3487_v62, 3  ;;  %v3238_v62 = vld [vmem:[#allocation11 + $0xb0] sm:$0xff] }
 0x1dd   :  { %1204 = vmatprep.subr.mxu0 %v3469_v54  ;;  %1275 = vmatprep.subr.mxu1 %v3481_v60 }
 0x1de   :  { %1205 = vmatpush1.msra.mxu0 %v3482_v55  ;;  %1276 = vmatpush1.msra.mxu1 %v3472_v57 }
 0x1df   :  { %1206 = vmatprep.subr.mxu0 %v3473_v48  ;;  %1277 = vmatprep.subr.mxu1 %v3474_v1 }
 0x1e0   :  { %1207 = vmatpush1.msra.mxu0 %v3475_v0  ;;  %1240 = vmatprep.mubr.f32.mxu0 %v3476_v29 }
 0x1e1   :  { %1278 = vmatpush1.msra.mxu1 %v3477_v51  ;;  %1311 = vmatprep.mubr.f32.mxu1 %v3476_v29 }
 0x1e2   :  { %1241 = vmatmul.mubr.f32.vlgmr.msra.gmra.mxu0 %v1174_v59  ;;  %1312 = vmatmul.mubr.f32.vlgmr.msra.gmra.mxu1 %v1174_v59  ;;  %v3217_v59 = vld [vmem:[#allocation11 + $0xc8] sm:$0xff] }
 0x1e3   :  { %1374 = vmatprep.subr.mxu0 %v3478_v2  ;;  %1445 = vmatprep.subr.mxu1 %v3479_v61  ;;  %v3229_v2 = vld [vmem:[#allocation11 + $0xa8] sm:$0xff]  ;;  %v3232_v61 = vld [vmem:[#allocation11 + $0xb8] sm:$0xff] }
 0x1e4   :  { %1375 = vmatpush1.msra.mxu0 %v2558_v5  ;;  %1446 = vmatpush1.msra.mxu1 %v2560_v6  ;;  %v3488_v5 = vld [vmem:[#allocation26_spill] sm:$0xff]  ;;  %v3489_v6 = vld [vmem:[#allocation36_spill] sm:$0xff]  ;;  %3492 = vst [vmem:[#allocation25_spill] sm:$0xff] %v3232_v61 }
 0x1e5   :  { %1376 = vmatprep.subr.mxu0 %v2563_v7  ;;  %1447 = vmatprep.subr.mxu1 %v2565_v8  ;;  %v3490_v7 = vld [vmem:[#allocation37_spill] sm:$0xff] }
 0x1e6   :  { %1377 = vmatpush1.msra.mxu0 %v2568_v9  ;;  %1448 = vmatpush1.msra.mxu1 %v2570_v10  ;;  %v3491_v8 = vld [vmem:[#allocation49_spill] sm:$0xff]  ;;  %v3109_v10 = vld [vmem:[#allocation11 + $0x1e8] sm:$0xff] }
 0x1e7   :  { %1378 = vmatprep.subr.mxu0 %v2574_v11  ;;  %1449 = vmatprep.subr.mxu1 %v2576_v12  ;;  %v1372_v9 = vrot.slane %v3491_v8, 4  ;;  %v3112_v11 = vld [vmem:[#allocation11 + $0x1f8] sm:$0xff]  ;;  %v3115_v12 = vld [vmem:[#allocation11 + $0x1e0] sm:$0xff] }
 0x1e8   :  { %1379 = vmatpush1.msra.mxu0 %v2580_v13  ;;  %1450 = vmatpush1.msra.mxu1 %v2582_v14  ;;  %v3118_v13 = vld [vmem:[#allocation11 + $0x1f0] sm:$0xff]  ;;  %v3121_v14 = vld [vmem:[#allocation11 + $0x1c8] sm:$0xff]  ;;  %v3244_v8 = vld [vmem:[#allocation11 + $0x98] sm:$0xff] }
 0x1e9   :  { %1380 = vmatprep.subr.mxu0 %v2586_v15  ;;  %1451 = vmatprep.subr.mxu1 %v2588_v16  ;;  %v3124_v15 = vld [vmem:[#allocation11 + $0x1d8] sm:$0xff]  ;;  %v3127_v16 = vld [vmem:[#allocation11 + $0x1c0] sm:$0xff] }
 0x1ea   :  { %1381 = vmatpush1.msra.mxu0 %v2592_v17  ;;  %1452 = vmatpush1.msra.mxu1 %v2594_v18  ;;  %v3130_v17 = vld [vmem:[#allocation11 + $0x1d0] sm:$0xff]  ;;  %v3133_v18 = vld [vmem:[#allocation11 + $0x1a8] sm:$0xff] }
 0x1eb   :  { %1382 = vmatprep.subr.mxu0 %v2598_v19  ;;  %1453 = vmatprep.subr.mxu1 %v2600_v20  ;;  %v3136_v19 = vld [vmem:[#allocation11 + $0x1b8] sm:$0xff]  ;;  %v3139_v20 = vld [vmem:[#allocation11 + $0x1a0] sm:$0xff] }
 0x1ec   :  { %1383 = vmatpush1.msra.mxu0 %v2604_v21  ;;  %1454 = vmatpush1.msra.mxu1 %v2606_v22  ;;  %v3142_v21 = vld [vmem:[#allocation11 + $0x1b0] sm:$0xff]  ;;  %v3145_v22 = vld [vmem:[#allocation11 + $0x188] sm:$0xff] }
 0x1ed   :  { %1384 = vmatprep.subr.mxu0 %v2610_v23  ;;  %1455 = vmatprep.subr.mxu1 %v2612_v24  ;;  %v3148_v23 = vld [vmem:[#allocation11 + $0x198] sm:$0xff]  ;;  %v3151_v24 = vld [vmem:[#allocation11 + $0x180] sm:$0xff] }
 0x1ee   :  { %1385 = vmatpush1.msra.mxu0 %v2616_v25  ;;  %1456 = vmatpush1.msra.mxu1 %v2618_v26  ;;  %v3154_v25 = vld [vmem:[#allocation11 + $0x190] sm:$0xff]  ;;  %v3157_v26 = vld [vmem:[#allocation11 + $0x168] sm:$0xff] }
 0x1ef   :  { %1386 = vmatprep.subr.mxu0 %v2622_v27  ;;  %1457 = vmatprep.subr.mxu1 %v2624_v28  ;;  %v3160_v27 = vld [vmem:[#allocation11 + $0x178] sm:$0xff]  ;;  %v3163_v28 = vld [vmem:[#allocation11 + $0x160] sm:$0xff] }
 0x1f0   :  { %1387 = vmatpush1.msra.mxu0 %v2628_v30  ;;  %1458 = vmatpush1.msra.mxu1 %v2630_v31  ;;  %v3166_v30 = vld [vmem:[#allocation11 + $0x170] sm:$0xff]  ;;  %v3169_v31 = vld [vmem:[#allocation11 + $0x148] sm:$0xff] }
 0x1f1   :  { %1388 = vmatprep.subr.mxu0 %v2634_v32  ;;  %1459 = vmatprep.subr.mxu1 %v2636_v33  ;;  %v3172_v32 = vld [vmem:[#allocation11 + $0x158] sm:$0xff]  ;;  %v3175_v33 = vld [vmem:[#allocation11 + $0x140] sm:$0xff] }
 0x1f2   :  { %1389 = vmatpush1.msra.mxu0 %v2640_v34  ;;  %1460 = vmatpush1.msra.mxu1 %v2642_v35  ;;  %v3178_v34 = vld [vmem:[#allocation11 + $0x150] sm:$0xff]  ;;  %v3181_v35 = vld [vmem:[#allocation11 + $0x128] sm:$0xff] }
 0x1f3   :  { %1390 = vmatprep.subr.mxu0 %v2646_v36  ;;  %1461 = vmatprep.subr.mxu1 %v2648_v37  ;;  %v3184_v36 = vld [vmem:[#allocation11 + $0x138] sm:$0xff]  ;;  %v3187_v37 = vld [vmem:[#allocation11 + $0x120] sm:$0xff] }
 0x1f4   :  { %1391 = vmatpush1.msra.mxu0 %v2652_v38  ;;  %1462 = vmatpush1.msra.mxu1 %v2654_v39  ;;  %v3190_v38 = vld [vmem:[#allocation11 + $0x130] sm:$0xff]  ;;  %v3193_v39 = vld [vmem:[#allocation11 + $0x108] sm:$0xff] }
 0x1f5   :  { %1392 = vmatprep.subr.mxu0 %v2658_v40  ;;  %1463 = vmatprep.subr.mxu1 %v2660_v41  ;;  %v3196_v40 = vld [vmem:[#allocation11 + $0x118] sm:$0xff]  ;;  %v3199_v41 = vld [vmem:[#allocation11 + $0x100] sm:$0xff] }
 0x1f6   :  { %1393 = vmatpush1.msra.mxu0 %v2664_v42  ;;  %1464 = vmatpush1.msra.mxu1 %v2666_v43  ;;  %v3202_v42 = vld [vmem:[#allocation11 + $0x110] sm:$0xff]  ;;  %v3205_v43 = vld [vmem:[#allocation11 + $0xe8] sm:$0xff] }
 0x1f7   :  { %1394 = vmatprep.subr.mxu0 %v2670_v44  ;;  %1465 = vmatprep.subr.mxu1 %v2672_v45  ;;  %v3208_v44 = vld [vmem:[#allocation11 + $0xf8] sm:$0xff]  ;;  %v3211_v45 = vld [vmem:[#allocation11 + $0xe0] sm:$0xff] }
 0x1f8   :  { %1395 = vmatpush1.msra.mxu0 %v3455_v58  ;;  %1466 = vmatpush1.msra.mxu1 %v3488_v5  ;;  %v3214_v58 = vld [vmem:[#allocation11 + $0xf0] sm:$0xff]  ;;  %v3241_v5 = vld [vmem:[#allocation11 + $0x88] sm:$0xff] }
 0x1f9   :  { %1396 = vmatprep.subr.mxu0 %v3457_v3  ;;  %1467 = vmatprep.subr.mxu1 %v3458_v4  ;;  %v3220_v3 = vld [vmem:[#allocation11 + $0xd8] sm:$0xff]  ;;  %v3223_v4 = vld [vmem:[#allocation11 + $0xc0] sm:$0xff] }
 0x1fa   :  { %1397 = vmatpush1.msra.mxu0 %v3459_v53  ;;  %1468 = vmatpush1.msra.mxu1 %v3484_v49  ;;  %v3226_v53 = vld [vmem:[#allocation11 + $0xd0] sm:$0xff]  ;;  %v3235_v49 = vld [vmem:[#allocation11 + $0xa0] sm:$0xff] }
 0x1fb   :  { %1398 = vmatprep.subr.mxu0 %v3461_v56  ;;  %1469 = vmatprep.subr.mxu1 %v3462_v63 }
 0x1fc   :  { %1399 = vmatpush1.msra.mxu0 %v3463_v52  ;;  %1470 = vmatpush1.msra.mxu1 %v3464_v50 }
 0x1fd   :  { %1400 = vmatprep.subr.mxu0 %v3465_v47  ;;  %1471 = vmatprep.subr.mxu1 %v3489_v6 }
 0x1fe   :  { %1401 = vmatpush1.msra.mxu0 %v3490_v7  ;;  %1472 = vmatpush1.msra.mxu1 %v3468_v46 }
 0x1ff   :  { %1402 = vmatprep.subr.mxu0 %v3469_v54  ;;  %1473 = vmatprep.subr.mxu1 %v3481_v60 }
 0x200   :  { %1403 = vmatpush1.msra.mxu0 %v3482_v55  ;;  %1474 = vmatpush1.msra.mxu1 %v3472_v57 }
 0x201   :  { %1404 = vmatprep.subr.mxu0 %v3473_v48  ;;  %1475 = vmatprep.subr.mxu1 %v3474_v1 }
 0x202   :  { %1405 = vmatpush1.msra.mxu0 %v3475_v0  ;;  %1438 = vmatprep.mubr.f32.mxu0 %v3476_v29 }
 0x203   :  { %1476 = vmatpush1.msra.mxu1 %v3477_v51  ;;  %1509 = vmatprep.mubr.f32.mxu1 %v3476_v29 }
 0x204   :  { %1439 = vmatmul.mubr.f32.vlgmr.msra.gmra.mxu0 %v1372_v9  ;;  %1510 = vmatmul.mubr.f32.vlgmr.msra.gmra.mxu1 %v1372_v9  ;;  %v3247_v9 = vld [vmem:[#allocation11 + $0x80] sm:$0xff] }
 0x205   :  { %1572 = vmatprep.subr.mxu0 %v3109_v10  ;;  %1643 = vmatprep.subr.mxu1 %v3112_v11 }
 0x206   :  { %1573 = vmatpush1.msra.mxu0 %v3115_v12  ;;  %1644 = vmatpush1.msra.mxu1 %v3118_v13 }
 0x207   :  { %1574 = vmatprep.subr.mxu0 %v3121_v14  ;;  %1645 = vmatprep.subr.mxu1 %v3124_v15 }
 0x208   :  { %1575 = vmatpush1.msra.mxu0 %v3127_v16  ;;  %1646 = vmatpush1.msra.mxu1 %v3130_v17 }
 0x209   :  { %1576 = vmatprep.subr.mxu0 %v3133_v18  ;;  %1647 = vmatprep.subr.mxu1 %v3136_v19 }
 0x20a   :  { %1577 = vmatpush1.msra.mxu0 %v3139_v20  ;;  %1648 = vmatpush1.msra.mxu1 %v3142_v21 }
 0x20b   :  { %1578 = vmatprep.subr.mxu0 %v3145_v22  ;;  %1649 = vmatprep.subr.mxu1 %v3148_v23 }
 0x20c   :  { %1579 = vmatpush1.msra.mxu0 %v3151_v24  ;;  %1650 = vmatpush1.msra.mxu1 %v3154_v25 }
 0x20d   :  { %1580 = vmatprep.subr.mxu0 %v3157_v26  ;;  %1651 = vmatprep.subr.mxu1 %v3160_v27 }
 0x20e   :  { %1581 = vmatpush1.msra.mxu0 %v3163_v28  ;;  %1652 = vmatpush1.msra.mxu1 %v3166_v30 }
 0x20f   :  { %1582 = vmatprep.subr.mxu0 %v3169_v31  ;;  %1653 = vmatprep.subr.mxu1 %v3172_v32 }
 0x210   :  { %1583 = vmatpush1.msra.mxu0 %v3175_v33  ;;  %1654 = vmatpush1.msra.mxu1 %v3178_v34 }
 0x211   :  { %1584 = vmatprep.subr.mxu0 %v3181_v35  ;;  %1655 = vmatprep.subr.mxu1 %v3184_v36 }
 0x212   :  { %1585 = vmatpush1.msra.mxu0 %v3187_v37  ;;  %1656 = vmatpush1.msra.mxu1 %v3190_v38 }
 0x213   :  { %1586 = vmatprep.subr.mxu0 %v3193_v39  ;;  %1657 = vmatprep.subr.mxu1 %v3196_v40 }
 0x214   :  { %1587 = vmatpush1.msra.mxu0 %v3199_v41  ;;  %1658 = vmatpush1.msra.mxu1 %v3202_v42 }
 0x215   :  { %1588 = vmatprep.subr.mxu0 %v3205_v43  ;;  %1659 = vmatprep.subr.mxu1 %v3208_v44 }
 0x216   :  { %1589 = vmatpush1.msra.mxu0 %v3211_v45  ;;  %1660 = vmatpush1.msra.mxu1 %v3214_v58 }
 0x217   :  { %1590 = vmatprep.subr.mxu0 %v3217_v59  ;;  %1661 = vmatprep.subr.mxu1 %v3220_v3 }
 0x218   :  { %1591 = vmatpush1.msra.mxu0 %v3223_v4  ;;  %1662 = vmatpush1.msra.mxu1 %v3226_v53 }
 0x219   :  { %1592 = vmatprep.subr.mxu0 %v3229_v2  ;;  %1663 = vmatprep.subr.mxu1 %v3232_v61  ;;  %v3250_v61 = vld [vmem:[#allocation11 + $0x90] sm:$0xff] }
 0x21a   :  { %1593 = vmatpush1.msra.mxu0 %v3235_v49  ;;  %1664 = vmatpush1.msra.mxu1 %v3238_v62 }
 0x21b   :  { %1594 = vmatprep.subr.mxu0 %v3241_v5  ;;  %1665 = vmatprep.subr.mxu1 %v3244_v8 }
 0x21c   :  { %1595 = vmatpush1.msra.mxu0 %v3247_v9  ;;  %1666 = vmatpush1.msra.mxu1 %v3250_v61 }
 0x21d   :  { %1596 = vmatprep.subr.mxu0 %v3461_v56  ;;  %1667 = vmatprep.subr.mxu1 %v3462_v63  ;;  %v3493_v56 = vld [vmem:[#allocation50_spill] sm:$0xff] }
 0x21e   :  { %1597 = vmatpush1.msra.mxu0 %v3463_v52  ;;  %1668 = vmatpush1.msra.mxu1 %v3464_v50  ;;  %v1570_v63 = vrot.slane %v3493_v56, 5  ;;  %v2280_v52 = vld [vmem:[#allocation11 + $0x78] sm:$0xff] }
 0x21f   :  { %1598 = vmatprep.subr.mxu0 %v3465_v47  ;;  %1669 = vmatprep.subr.mxu1 %v3489_v6  ;;  %v2286_v6 = vld [vmem:[#allocation11 + $0x50] sm:$0xff] }
 0x220   :  { %1599 = vmatpush1.msra.mxu0 %v3490_v7  ;;  %1670 = vmatpush1.msra.mxu1 %v3468_v46  ;;  %v2282_v46 = vld [vmem:[#allocation11 + $0x70] sm:$0xff]  ;;  %v2287_v7 = vld [vmem:[#allocation11 + $0x28] sm:$0xff] }
 0x221   :  { %1600 = vmatprep.subr.mxu0 %v3469_v54  ;;  %1671 = vmatprep.subr.mxu1 %v3481_v60  ;;  %v2283_v54 = vld [vmem:[#allocation11 + $0x48] sm:$0xff]  ;;  %v2285_v60 = vld [vmem:[#allocation11 + $0x40] sm:$0xff] }
 0x222   :  { %1601 = vmatpush1.msra.mxu0 %v3482_v55  ;;  %1672 = vmatpush1.msra.mxu1 %v3472_v57  ;;  %v2279_v55 = vld [vmem:[#allocation11 + $0x68] sm:$0xff]  ;;  %v2284_v57 = vld [vmem:[#allocation11 + $0x58] sm:$0xff] }
 0x223   :  { %1602 = vmatprep.subr.mxu0 %v3473_v48  ;;  %1673 = vmatprep.subr.mxu1 %v3474_v1 }
 0x224   :  { %1603 = vmatpush1.msra.mxu0 %v3475_v0  ;;  %1636 = vmatprep.mubr.f32.mxu0 %v3476_v29  ;;  %v3494_v0 = vld [vmem:[#allocation25_spill] sm:$0xff] }
 0x225   :  { %1674 = vmatpush1.msra.mxu1 %v3477_v51  ;;  %1707 = vmatprep.mubr.f32.mxu1 %v3476_v29  ;;  %v2281_v51 = vld [vmem:[#allocation11 + $0x60] sm:$0xff] }
 0x226   :  { %1637 = vmatmul.mubr.f32.vlgmr.msra.gmra.mxu0 %v1570_v63  ;;  %1708 = vmatmul.mubr.f32.vlgmr.msra.gmra.mxu1 %v1570_v63 }
 0x227   :  { %1770 = vmatprep.subr.mxu0 %v3109_v10  ;;  %1841 = vmatprep.subr.mxu1 %v3112_v11  ;;  %v2288_v10 = vld [vmem:[#allocation11 + $0x38] sm:$0xff]  ;;  %v2289_v11 = vld [vmem:[#allocation11 + $0x20] sm:$0xff] }
 0x228   :  { %1771 = vmatpush1.msra.mxu0 %v3115_v12  ;;  %1842 = vmatpush1.msra.mxu1 %v3118_v13  ;;  %v2290_v12 = vld [vmem:[#allocation11 + $0x30] sm:$0xff]  ;;  %v2291_v13 = vld [vmem:[#allocation11 + $0x8] sm:$0xff] }
 0x229   :  { %1772 = vmatprep.subr.mxu0 %v3121_v14  ;;  %1843 = vmatprep.subr.mxu1 %v3124_v15  ;;  %v2292_v14 = vld [vmem:[#allocation11 + $0x18] sm:$0xff]  ;;  %v2293_v15 = vld [vmem:[#allocation11] sm:$0xff] }
 0x22a   :  { %1773 = vmatpush1.msra.mxu0 %v3127_v16  ;;  %1844 = vmatpush1.msra.mxu1 %v3130_v17  ;;  %v3495_v16 = vld [vmem:[#allocation51_spill] sm:$0xff] }
 0x22b   :  { %1774 = vmatprep.subr.mxu0 %v3133_v18  ;;  %1845 = vmatprep.subr.mxu1 %v3136_v19  ;;  %v1768_v17 = vrot.slane %v3495_v16, 6  ;;  %v2294_v18 = vld [vmem:[#allocation11 + $0x10] sm:$0xff]  ;;  %v1981_v19 = vld [vmem:[#allocation13 + $0x78] sm:$0xff] }
 0x22c   :  { %1775 = vmatpush1.msra.mxu0 %v3139_v20  ;;  %1846 = vmatpush1.msra.mxu1 %v3142_v21  ;;  %v1980_v20 = vld [vmem:[#allocation13 + $0x70] sm:$0xff]  ;;  %v1979_v21 = vld [vmem:[#allocation13 + $0x68] sm:$0xff] }
 0x22d   :  { %1776 = vmatprep.subr.mxu0 %v3145_v22  ;;  %1847 = vmatprep.subr.mxu1 %v3148_v23  ;;  %v1978_v22 = vld [vmem:[#allocation13 + $0x60] sm:$0xff]  ;;  %v1977_v23 = vld [vmem:[#allocation13 + $0x58] sm:$0xff] }
 0x22e   :  { %1777 = vmatpush1.msra.mxu0 %v3151_v24  ;;  %1848 = vmatpush1.msra.mxu1 %v3154_v25  ;;  %v1976_v24 = vld [vmem:[#allocation13 + $0x50] sm:$0xff]  ;;  %v1975_v25 = vld [vmem:[#allocation13 + $0x48] sm:$0xff] }
 0x22f   :  { %1778 = vmatprep.subr.mxu0 %v3157_v26  ;;  %1849 = vmatprep.subr.mxu1 %v3160_v27  ;;  %v1974_v26 = vld [vmem:[#allocation13 + $0x40] sm:$0xff]  ;;  %v1973_v27 = vld [vmem:[#allocation13 + $0x38] sm:$0xff] }
 0x230   :  { %1779 = vmatpush1.msra.mxu0 %v3163_v28  ;;  %1850 = vmatpush1.msra.mxu1 %v3166_v30  ;;  %v1972_v28 = vld [vmem:[#allocation13 + $0x30] sm:$0xff]  ;;  %v1971_v30 = vld [vmem:[#allocation13 + $0x28] sm:$0xff] }
 0x231   :  { %1780 = vmatprep.subr.mxu0 %v3169_v31  ;;  %1851 = vmatprep.subr.mxu1 %v3172_v32  ;;  %v1970_v31 = vld [vmem:[#allocation13 + $0x20] sm:$0xff] }
 0x232   :  { %1781 = vmatpush1.msra.mxu0 %v3175_v33  ;;  %1852 = vmatpush1.msra.mxu1 %v3178_v34  ;;  %v1969_v34 = vld [vmem:[#allocation13 + $0x18] sm:$0xff] }
 0x233   :  { %1782 = vmatprep.subr.mxu0 %v3181_v35  ;;  %1853 = vmatprep.subr.mxu1 %v3184_v36 }
 0x234   :  { %1783 = vmatpush1.msra.mxu0 %v3187_v37  ;;  %1854 = vmatpush1.msra.mxu1 %v3190_v38  ;;  %v1968_v37 = vld [vmem:[#allocation13 + $0x10] sm:$0xff]  ;;  %v1967_v38 = vld [vmem:[#allocation13 + $0x8] sm:$0xff] }
 0x235   :  { %1784 = vmatprep.subr.mxu0 %v3193_v39  ;;  %1855 = vmatprep.subr.mxu1 %v3196_v40  ;;  %v1966_v39 = vld [vmem:[#allocation13] sm:$0xff]  ;;  %v1965_v40 = vld [vmem:[#allocation4] sm:$0xff] }
 0x236   :  { %1785 = vmatpush1.msra.mxu0 %v3199_v41  ;;  %1856 = vmatpush1.msra.mxu1 %v3202_v42 }
 0x237   :  { %1786 = vmatprep.subr.mxu0 %v3205_v43  ;;  %1857 = vmatprep.subr.mxu1 %v3208_v44 }
 0x238   :  { %1787 = vmatpush1.msra.mxu0 %v3211_v45  ;;  %1858 = vmatpush1.msra.mxu1 %v3214_v58 }
 0x239   :  { %1788 = vmatprep.subr.mxu0 %v3217_v59  ;;  %1859 = vmatprep.subr.mxu1 %v3220_v3 }
 0x23a   :  { %1789 = vmatpush1.msra.mxu0 %v3223_v4  ;;  %1860 = vmatpush1.msra.mxu1 %v3226_v53 }
 0x23b   :  { %1790 = vmatprep.subr.mxu0 %v3229_v2  ;;  %1861 = vmatprep.subr.mxu1 %v3494_v0  ;;  %v2139_v0 = vld [vmem:[%s3359_s7] ss:$0 sm:$0xff] }
 0x23c   :  { %1791 = vmatpush1.msra.mxu0 %v3235_v49  ;;  %1862 = vmatpush1.msra.mxu1 %v3238_v62 }
 0x23d   :  { %1792 = vmatprep.subr.mxu0 %v3241_v5  ;;  %1863 = vmatprep.subr.mxu1 %v3244_v8  ;;  %v647_v1 = vpop.f32.mrf.mxu0  ;;  %v718_v48 = vpop.f32.mrf.mxu1 }
 0x23e   :  { %1793 = vmatpush1.msra.mxu0 %v3247_v9  ;;  %1864 = vmatpush1.msra.mxu1 %v3250_v61 }
 0x23f   :  { %1794 = vmatprep.subr.mxu0 %v2279_v55  ;;  %1865 = vmatprep.subr.mxu1 %v2280_v52  ;;  %v649_v50 = vpop.f32.mrf.mxu0  ;;  %v720_v47 = vpop.f32.mrf.mxu1 }
 0x240   :  { %1795 = vmatpush1.msra.mxu0 %v2281_v51  ;;  %1866 = vmatpush1.msra.mxu1 %v2282_v46 }
 0x241   :  { %1796 = vmatprep.subr.mxu0 %v2283_v54  ;;  %1867 = vmatprep.subr.mxu1 %v2284_v57 }
 0x242   :  { %1797 = vmatpush1.msra.mxu0 %v2285_v60  ;;  %1868 = vmatpush1.msra.mxu1 %v2286_v6 }
 0x243   :  { %1798 = vmatprep.subr.mxu0 %v2287_v7  ;;  %1869 = vmatprep.subr.mxu1 %v2288_v10 }
 0x244   :  { %1799 = vmatpush1.msra.mxu0 %v2289_v11  ;;  %1870 = vmatpush1.msra.mxu1 %v2290_v12 }
 0x245   :  { %1800 = vmatprep.subr.mxu0 %v2291_v13  ;;  %1871 = vmatprep.subr.mxu1 %v2292_v14 }
 0x246   :  { %1801 = vmatpush1.msra.mxu0 %v2293_v15  ;;  %1834 = vmatprep.mubr.f32.mxu0 %v3476_v29 }
 0x247   :  { %1872 = vmatpush1.msra.mxu1 %v2294_v18  ;;  %1905 = vmatprep.mubr.f32.mxu1 %v3476_v29 }
 0x248   :  { %1835 = vmatmul.mubr.f32.vlgmr.msra.gmra.mxu0 %v1768_v17  ;;  %1906 = vmatmul.mubr.f32.vlgmr.msra.gmra.mxu1 %v1768_v17 }
 0x249   :  { %2162 = vmatprep.subr.mxu0 %v3476_v29  ;;  %2194 = vmatprep.mubr.msk.f32.mxu0 %vm2475_vm0, %v3476_v29 }
 0x24a   :  { %2163 = vmatpush3.msra.mxu0 %v1981_v19 }
 0x24b   :  { %2164 = vmatprep.subr.mxu0 %v3476_v29 }
 0x24c   :  { %2165 = vmatpush3.msra.mxu0 %v1980_v20 }
 0x24d   :  { %2166 = vmatprep.subr.mxu0 %v3476_v29 }
 0x24e   :  { %2167 = vmatpush3.msra.mxu0 %v1979_v21 }
 0x24f   :  { %2168 = vmatprep.subr.mxu0 %v3476_v29 }
 0x250   :  { %2169 = vmatpush3.msra.mxu0 %v1978_v22 }
 0x251   :  { %2170 = vmatprep.subr.mxu0 %v3476_v29 }
 0x252   :  { %2171 = vmatpush3.msra.mxu0 %v1977_v23 }
 0x253   :  { %2172 = vmatprep.subr.mxu0 %v3476_v29 }
 0x254   :  { %2173 = vmatpush3.msra.mxu0 %v1976_v24 }
 0x255   :  { %2174 = vmatprep.subr.mxu0 %v3476_v29 }
 0x256   :  { %2175 = vmatpush3.msra.mxu0 %v1975_v25 }
 0x257   :  { %2176 = vmatprep.subr.mxu0 %v3476_v29 }
 0x258   :  { %2177 = vmatpush3.msra.mxu0 %v1974_v26 }
 0x259   :  { %2178 = vmatprep.subr.mxu0 %v3476_v29 }
 0x25a   :  { %2179 = vmatpush3.msra.mxu0 %v1973_v27 }
 0x25b   :  { %2180 = vmatprep.subr.mxu0 %v3476_v29 }
 0x25c   :  { %2181 = vmatpush3.msra.mxu0 %v1972_v28 }
 0x25d   :  { %2182 = vmatprep.subr.mxu0 %v3476_v29 }
 0x25e   :  { %2183 = vmatpush3.msra.mxu0 %v1971_v30  ;;  %v846_v32 = vpop.f32.mrf.mxu0  ;;  %v917_v33 = vpop.f32.mrf.mxu1 }
 0x25f   :  { %2184 = vmatprep.subr.mxu0 %v3476_v29 }
 0x260   :  { %2185 = vmatpush3.msra.mxu0 %v1970_v31  ;;  %v848_v35 = vpop.f32.mrf.mxu0  ;;  %v919_v36 = vpop.f32.mrf.mxu1 }
 0x261   :  { %2186 = vmatprep.subr.mxu0 %v3476_v29 }
 0x262   :  { %2187 = vmatpush3.msra.mxu0 %v1969_v34 }
 0x263   :  { %2188 = vmatprep.subr.mxu0 %v3476_v29 }
 0x264   :  { %2189 = vmatpush3.msra.mxu0 %v1968_v37 }
 0x265   :  { %2190 = vmatprep.subr.mxu0 %v3476_v29 }
 0x266   :  { %2191 = vmatpush3.msra.mxu0 %v1967_v38 }
 0x267   :  { %2192 = vmatprep.subr.mxu0 %v3476_v29 }
 0x268   :  { %2193 = vmatpush3.msra.mxu0 %v1966_v39 }
 0x269   :  { %2195 = vmatmul.mubr.f32.vlgmr.msra.gmra.mxu0 %v1965_v40 }
 0x280   :  { %v1044_v41 = vpop.f32.mrf.mxu0  ;;  %v1115_v42 = vpop.f32.mrf.mxu1 }
 0x282   :  { %v1046_v43 = vpop.f32.mrf.mxu0  ;;  %v1117_v44 = vpop.f32.mrf.mxu1 }
 0x2a2   :  { %v1242_v45 = vpop.f32.mrf.mxu0  ;;  %v1313_v58 = vpop.f32.mrf.mxu1 }
 0x2a4   :  { %v1244_v59 = vpop.f32.mrf.mxu0  ;;  %v1315_v3 = vpop.f32.mrf.mxu1 }
 0x2c4   :  { %v1440_v4 = vpop.f32.mrf.mxu0  ;;  %v1511_v53 = vpop.f32.mrf.mxu1 }
 0x2c6   :  { %v1442_v2 = vpop.f32.mrf.mxu0  ;;  %v1513_v61 = vpop.f32.mrf.mxu1 }
 0x2e6   :  { %v1638_v49 = vpop.f32.mrf.mxu0  ;;  %v1709_v62 = vpop.f32.mrf.mxu1 }
 0x2e8   :  { %v1640_v5 = vpop.f32.mrf.mxu0  ;;  %v1711_v8 = vpop.f32.mrf.mxu1 }
 0x308   :  { %v1836_v29 = vpop.f32.mrf.mxu0  ;;  %v1907_v9 = vpop.f32.mrf.mxu1 }
 0x30a   :  { %v1838_v56 = vpop.f32.mrf.mxu0  ;;  %v1909_v63 = vpop.f32.mrf.mxu1 }
 0x329   :  { %v2055_v1 = vpop.f32.mrf.mxu0 }
 0x32a   :  { %v2056_v48 = vadd.f32 %v2139_v0, %v2055_v1 }
 0x32b   :  { %v2196_v55 = vpop.f32.mrf.mxu0 }
 0x32c   :  { %2059 = vmax.xlane.f32.xlu0 %v2056_v48 }
 0x3b5   :  { %v2060_v52 = vpop.xlane.xlu0 %2059 }
 0x3b6   :  { %v2061_v50 = vsub.f32 %v2056_v48, %v2060_v52 }
 0x3b8   :  { %v2062_v47 = vmul.f32 1.442695, %v2061_v50 }
 0x3ba   :  { %2227 = vpow2.f32 %v2062_v47 }
 0x3c7   :  { %v2228_v51 = vpop.eup %2227 }
 0x3c8   :  { %2064 = vadd.xlane.f32.xlu0 %v2228_v51 }
 0x3c9   :  { %2406 = shalt.err (!%p2403_p1)
}
 0x3ca   :  { %2090 = dma.vmem_to_hbm [thread:$0]  %s2088_s24, 16, %s3361_s9, [#allocation16]  }
 0x3cb   :  { %s2477_s2 = smov [#allocation17]  }
 0x3cc   :  { %s2097_s28 = sshll.u32 %s2477_s2, 4  ;;  %s2098_s28 = int_to_ptr.vmem [resolvable:$true] %s2097_s28 }
 0x3cd   :  { %s2415_s29 = scalar_lea.vmem %s2098_s28, 16  ;;  %s2419_s30 = scalar_lea.vmem %s2098_s28, 32 }
 0x3ce   :  { %p2416_p2 = scmp.ne.s32.totalorder %s2098_s28, %s2415_s29  ;;  %p2420_p3 = scmp.lt.s32.totalorder %s2098_s28, %s2098_s28 }
 0x3cf   :  { %p2421_p4 = scmp.lt.s32.totalorder %s2419_s30, %s2415_s29 }
 0x3d1   :  { %p2422_p5 = por %p2421_p4, %p2420_p3 }
 0x3d3   :  { %p2423_p6 = pnand %p2422_p5, %p2416_p2 }
 0x3d5   :  { %2426 = shalt.err (!%p2423_p6)
}
 0x3d6   :  { %2100 = dma.vmem_to_hbm [thread:$0]  %s2098_s28, 16, %s3362_s10, [#allocation16]  }
 0x3d7   :  { %s2478_s13 = smov [#allocation14]  }
 0x3d8   :  { %s2077_s14 = sshll.u32 %s2478_s13, 4  ;;  %s2078_s14 = int_to_ptr.vmem [resolvable:$true] %s2077_s14 }
 0x3d9   :  { %s2435_s9 = scalar_lea.vmem %s2078_s14, 128  ;;  %p2440_p8 = scmp.lt.s32.totalorder %s2078_s14, %s2078_s14 }
 0x3da   :  { %p2436_p7 = scmp.ne.s32.totalorder %s2078_s14, %s2435_s9  ;;  %p2441_p9 = scmp.lt.s32.totalorder %s2435_s9, %s2435_s9 }
 0x3dc   :  { %p2442_p10 = por %p2441_p9, %p2440_p8 }
 0x3de   :  { %p2443_p11 = pnand %p2442_p10, %p2436_p7 }
 0x451   :  { %v2065_v46 = vpop.xlane.xlu0 %2064 }
 0x452   :  { %2229 = vrcp.f32 %v2065_v46 }
 0x45f   :  { %v2230_v54 = vpop.eup %2229 }
 0x460   :  { %v2067_v57 = vmul.f32 %v2230_v54, %v2228_v51 }
 0x462   :  { %2068 = vst [vmem:[#allocation14] sm:$0xff] %v2067_v57 }
 0x463   :  { %2446 = shalt.err (!%p2443_p11)
}
 0x464   :  { %2080 = dma.vmem_to_hbm [thread:$0]  %s2078_s14, 128, %s3360_s8, [#allocation7]  }
 0x465   :  { %2461 = dma.done.wait [#allocation7], 128  }
 0x466   :  { %2462 = vsyncadd [#allocation7], 4294967168 }
 0x467   :  { %2463 = dma.done.wait [#allocation16], 32  }
 0x468   :  { %2464 = vsyncadd [#allocation16], 4294967264 }
 0x469   :  { %2110 = vsyncpa [#allocation6], 1 }
 0x46a   :  { %2111 = vsyncpa [#allocation9], 1 }
 0x46b   :  { %2112 = vsyncpa [#allocation12], 1 }
 0x46c   :  { %2113 = vsyncpa [#allocation7], 1 }
 0x46d   :  { %2114 = vsyncpa [#allocation16], 1 }

</bundles_post_ra>
